<compile_context>
chip_gen: v7x
topology: tpu7x:2x2x1
jax: 0.10.0
libtpu: 0.0.40
codegen_flags: <defaults>
</compile_context>

<pallas_src>
import jax
import jax.numpy as jnp
from jax import lax
from jax.experimental import pallas as pl
from jax.experimental.pallas import tpu as pltpu


def _round_up(x, m):
    return (x + m - 1) // m * m


def _vmem_limit_bytes():
    """Per-generation VMEM limit with headroom (~48 MiB v7x, ~96 MiB v5e/v6e)."""
    cap = 128 * 1024 * 1024
    try:
        info = pltpu.get_tpu_info()
        cap = int(getattr(info, "vmem_capacity_bytes", cap) or cap)
    except Exception:
        pass
    return min(cap * 3 // 4, 100 * 1024 * 1024)


def _make_attention_kernel(H, hd, TQ, Np, has_bias, n_valid, compute_dtype):
    """Kernel factory (separate trace per bias / padding / dtype variant)."""
    C = H * hd
    cdt = compute_dtype
    masked = (n_valid is not None) and (n_valid < Np)

    def kernel(x_ref, wq_ref, bq_ref, wkv_ref, bkv_ref, wp_ref, bp_ref, *rest):
        if has_bias:
            bias_ref, out_ref, attn_ref, kv_ref, o_ref = rest
        else:
            out_ref, attn_ref, kv_ref, o_ref = rest

        qi = pl.program_id(1)

        # ---- K/V projection: once per batch, cached in VMEM scratch --------
        # Fused (Np, C) x (C, 2C) matmul -> full MXU lane utilization.
        @pl.when(qi == 0)
        def _():
            xf = x_ref[0].astype(cdt)                                   # (Np, C)
            kv = jnp.dot(xf, wkv_ref[...],
                         preferred_element_type=jnp.float32) + bkv_ref[...]
            kv_ref[...] = kv.astype(cdt)                                # (Np, 2C)

        # ---- Q projection for this query tile (full C-wide output) ---------
        row0 = pl.multiple_of(qi * TQ, TQ)
        xq = x_ref[0, pl.ds(row0, TQ), :].astype(cdt)                   # (TQ, C)
        q = jnp.dot(xq, wq_ref[...],
                    preferred_element_type=jnp.float32) + bq_ref[...]
        q = q.astype(cdt)                                               # (TQ, C)

        if masked:
            col = lax.broadcasted_iota(jnp.int32, (TQ, Np), 1)
            neg = jnp.where(col >= n_valid, -1e30, 0.0).astype(jnp.float32)

        # ---- per-head attention (static unrolled loop over heads) ----------
        for h in range(H):
            qh = q[:, h * hd:(h + 1) * hd]                              # (TQ, hd)
            kh = kv_ref[:, h * hd:(h + 1) * hd]                         # (Np, hd)
            vh = kv_ref[:, C + h * hd:C + (h + 1) * hd]                 # (Np, hd)

            # Unscaled logits, matching the torch module (no 1/sqrt(hd)).
            # TODO(synk): store K^T in the scratch if a bundle dump shows
            # per-step vxpose traffic on this transposed-RHS dot.
            s = lax.dot_general(qh, kh, (((1,), (1,)), ((), ())),
                                preferred_element_type=jnp.float32)     # (TQ, Np)
            if has_bias:
                s = s + bias_ref[0, h].astype(jnp.float32)
            if masked:
                s = s + neg

            # Numerically stable softmax in f32.
            m = jnp.max(s, axis=-1, keepdims=True)
            p = jnp.exp(s - m)
            denom = jnp.sum(p, axis=-1, keepdims=True)
            # EUP reciprocal + one Newton refinement (attn is a returned output).
            r = pl.reciprocal(denom, approx=True)
            r = r * (2.0 - denom * r)
            p = p * r

            attn_ref[0, h] = p.astype(attn_ref.dtype)                   # (TQ, Np)
            o_ref[:, h * hd:(h + 1) * hd] = jnp.dot(
                p.astype(cdt), vh, preferred_element_type=jnp.float32)  # (TQ, hd)

        # ---- single full-width output projection (TQ,C) x (C,C) ------------
        o = o_ref[...].astype(cdt)
        out = jnp.dot(o, wp_ref[...],
                      preferred_element_type=jnp.float32) + bp_ref[...]
        out_ref[0] = out.astype(out_ref.dtype)

    return kernel


def attention_forward(x, wqkv, bqkv, wproj, bproj, heads, bias=None,
                      compute_dtype=jnp.bfloat16, attn_dtype=jnp.float32,
                      tq=128):
    """x: (B, N, C) f32.  wqkv: (C, 3C), wproj: (C, C)  (pre-transposed, i.e.
    y = x @ W + b).  bias: optional (B, H, N, N) additive logit bias (kept in
    its native dtype).  Returns (out (B,N,C) f32, attn (B,H,N,N) attn_dtype)."""
    B, N, C = x.shape
    H = heads
    assert C % H == 0, "dim must be divisible by heads"
    hd = C // H
    cdt = compute_dtype

    # --- query-tile size & sequence padding (keeps TQ MXU-friendly) ---------
    if N <= tq:
        Np = _round_up(N, 8)            # tiny sequences: one tile, 8-sublane
        TQ = Np
    else:
        TQ = tq
        Np = _round_up(N, TQ)
    QT = Np // TQ
    pad = Np - N

    xp = x if pad == 0 else jnp.pad(x, ((0, 0), (0, pad), (0, 0)))
    bias_p = None
    if bias is not None:
        bias_p = bias if pad == 0 else jnp.pad(
            bias, ((0, 0), (0, 0), (0, pad), (0, pad)))

    # --- weight layout: fused-qkv output columns are (3, H, hd), matching the
    #     torch reshape(B, N, 3, H, hd).  Q separate; K/V fused into (C, 2C).
    wq = wqkv[:, 0:C].astype(cdt)                       # (C, C)
    wkv = wqkv[:, C:3 * C].astype(cdt)                  # (C, 2C)  [K | V]
    bq = bqkv[0:C].reshape(1, C).astype(jnp.float32)
    bkv = bqkv[C:3 * C].reshape(1, 2 * C).astype(jnp.float32)
    wp = wproj.astype(cdt)                              # (C, C)
    bp = bproj.reshape(1, C).astype(jnp.float32)

    has_bias = bias is not None

    in_specs = [
        # full sequence; index depends only on b -> stays resident across q
        pl.BlockSpec((1, Np, C), lambda b, q: (b, 0, 0)),
        # weights/biases: constant index_map -> resident (no per-step re-DMA)
        pl.BlockSpec((C, C), lambda b, q: (0, 0)),          # Wq
        pl.BlockSpec((1, C), lambda b, q: (0, 0)),          # bq
        pl.BlockSpec((C, 2 * C), lambda b, q: (0, 0)),      # Wkv
        pl.BlockSpec((1, 2 * C), lambda b, q: (0, 0)),      # bkv
        pl.BlockSpec((C, C), lambda b, q: (0, 0)),          # Wproj
        pl.BlockSpec((1, C), lambda b, q: (0, 0)),          # bproj
    ]
    args = [xp, wq, bq, wkv, bkv, wp, bp]
    if has_bias:
        in_specs.append(
            pl.BlockSpec((1, H, TQ, Np), lambda b, q: (b, 0, q, 0)))
        args.append(bias_p)                                 # native dtype

    out_specs = [
        pl.BlockSpec((1, TQ, C), lambda b, q: (b, q, 0)),           # out
        pl.BlockSpec((1, H, TQ, Np), lambda b, q: (b, 0, q, 0)),    # attn
    ]
    out_shape = (
        jax.ShapeDtypeStruct((B, Np, C), jnp.float32),
        jax.ShapeDtypeStruct((B, H, Np, Np), attn_dtype),
    )

    kernel = _make_attention_kernel(H, hd, TQ, Np, has_bias,
                                    N if pad else None, cdt)

    out, attn = pl.pallas_call(
        kernel,
        out_shape=out_shape,
        grid_spec=pltpu.PrefetchScalarGridSpec(
            num_scalar_prefetch=0,
            grid=(B, QT),
            in_specs=in_specs,
            out_specs=out_specs,
            scratch_shapes=[
                pltpu.VMEM((Np, 2 * C), cdt),          # cached K|V for batch b
                pltpu.VMEM((TQ, C), jnp.float32),      # concatenated head outs
            ],
        ),
        compiler_params=pltpu.CompilerParams(
            # q axis carries the K/V cache -> must be arbitrary; b is parallel
            dimension_semantics=("parallel", "arbitrary"),
            vmem_limit_bytes=_vmem_limit_bytes(),
        ),
    )(*args)

    if pad:
        out = out[:, :N]
        attn = attn[:, :, :N, :N]
    return out, attn


def _reference(x, wqkv, bqkv, wproj, bproj, heads, bias):
    B, N, C = x.shape
    hd = C // heads
    qkv = x @ wqkv + bqkv                                  # (B,N,3C)
    qkv = qkv.reshape(B, N, 3, heads, hd).transpose(2, 0, 3, 1, 4)
    q, k, v = qkv[0], qkv[1], qkv[2]                       # (B,H,N,hd)
    s = jnp.einsum('bhnd,bhmd->bhnm', q, k)
    if bias is not None:
        s = s + bias
    attn = jax.nn.softmax(s, axis=-1)
    o = jnp.einsum('bhnm,bhmd->bhnd', attn, v)
    o = o.transpose(0, 2, 1, 3).reshape(B, N, C)
    out = o @ wproj + bproj
    return out, attn


def _make_inputs(key, B, N, C, H):
    k1, k2, k3, k4, k5, k6 = jax.random.split(key, 6)
    x = jax.random.normal(k1, (B, N, C), jnp.float32)
    # nn.Linear(dim, dim*3): weight (3C, C) -> pass transposed (C, 3C)
    wqkv = jax.random.normal(k2, (C, 3 * C), jnp.float32) * 0.1
    bqkv = jax.random.normal(k3, (3 * C,), jnp.float32) * 0.1
    wproj = jax.random.normal(k4, (C, C), jnp.float32) * 0.1
    bproj = jax.random.normal(k5, (C,), jnp.float32) * 0.1
    bias = jax.random.normal(k6, (B, H, N, N), jnp.float32) * 0.1
    return x, wqkv, bqkv, wproj, bproj, bias


if __name__ == "__main__":
    # ---- small shape (module-consistent), f32 compute, with bias ----------
    B, N, C, H = 2, 8, 32, 4
    x, wqkv, bqkv, wproj, bproj, bias = _make_inputs(jax.random.PRNGKey(0),
                                                     B, N, C, H)
    ref_out, ref_attn = _reference(x, wqkv, bqkv, wproj, bproj, H, bias)

    out, attn = attention_forward(x, wqkv, bqkv, wproj, bproj, H, bias=bias,
                                  compute_dtype=jnp.float32)
    jax.block_until_ready((out, attn))
    assert jnp.allclose(out, ref_out, atol=1e-2, rtol=1e-2)
    assert jnp.allclose(attn, ref_attn, atol=5e-3, rtol=1e-2)

    # ---- same shape, bf16 MXU operands (f32 accumulate), with bias --------
    out, attn = attention_forward(x, wqkv, bqkv, wproj, bproj, H, bias=bias,
                                  compute_dtype=jnp.bfloat16)
    jax.block_until_ready((out, attn))
    assert jnp.allclose(out, ref_out, atol=6e-2, rtol=6e-2)
    assert jnp.allclose(attn, ref_attn, atol=3e-2, rtol=3e-2)

    # ---- bias=None variant, bf16 compute, bf16 attn writeback -------------
    ref_out_nb, ref_attn_nb = _reference(x, wqkv, bqkv, wproj, bproj, H, None)
    out, attn = attention_forward(x, wqkv, bqkv, wproj, bproj, H, bias=None,
                                  compute_dtype=jnp.bfloat16,
                                  attn_dtype=jnp.bfloat16)
    jax.block_until_ready((out, attn))
    assert jnp.allclose(out, ref_out_nb, atol=6e-2, rtol=6e-2)
    assert jnp.allclose(attn.astype(jnp.float32), ref_attn_nb,
                        atol=3e-2, rtol=3e-2)

    # ---- larger aligned shape: 2 query tiles, K/V cache reused over q -----
    B2, N2, C2, H2 = 1, 256, 128, 4
    x2, wqkv2, bqkv2, wproj2, bproj2, bias2 = _make_inputs(
        jax.random.PRNGKey(1), B2, N2, C2, H2)
    ref_out2, ref_attn2 = _reference(x2, wqkv2, bqkv2, wproj2, bproj2, H2, bias2)
    out2, attn2 = attention_forward(x2, wqkv2, bqkv2, wproj2, bproj2, H2,
                                    bias=bias2, compute_dtype=jnp.float32)
    jax.block_until_ready((out2, attn2))
    assert jnp.allclose(out2, ref_out2, atol=1e-2, rtol=1e-2)
    assert jnp.allclose(attn2, ref_attn2, atol=5e-3, rtol=1e-2)

    # ---- non-128-aligned N: exercises padding + key-column masking --------
    B3, N3, C3, H3 = 1, 200, 128, 4
    x3, wqkv3, bqkv3, wproj3, bproj3, bias3 = _make_inputs(
        jax.random.PRNGKey(2), B3, N3, C3, H3)
    ref_out3, ref_attn3 = _reference(x3, wqkv3, bqkv3, wproj3, bproj3, H3, bias3)
    out3, attn3 = attention_forward(x3, wqkv3, bqkv3, wproj3, bproj3, H3,
                                    bias=bias3, compute_dtype=jnp.float32)
    jax.block_until_ready((out3, attn3))
    assert jnp.allclose(out3, ref_out3, atol=1e-2, rtol=1e-2)
    assert jnp.allclose(attn3, ref_attn3, atol=5e-3, rtol=1e-2)

    print("KERNEL_OK")
</pallas_src>

<mosaic_0001>
module attributes {stable_mosaic.version = 11 : i64} {
  func.func @kernel(%arg0: i32, %arg1: i32, %arg2: memref<1x8x32xf32, #tpu.memory_space<vmem>>, %arg3: memref<32x32xf32, #tpu.memory_space<vmem>>, %arg4: memref<1x32xf32, #tpu.memory_space<vmem>>, %arg5: memref<32x64xf32, #tpu.memory_space<vmem>>, %arg6: memref<1x64xf32, #tpu.memory_space<vmem>>, %arg7: memref<32x32xf32, #tpu.memory_space<vmem>>, %arg8: memref<1x32xf32, #tpu.memory_space<vmem>>, %arg9: memref<1x4x8x8xf32, #tpu.memory_space<vmem>>, %arg10: memref<1x8x32xf32, #tpu.memory_space<vmem>>, %arg11: memref<1x4x8x8xf32, #tpu.memory_space<vmem>>, %arg12: memref<8x64xf32, #tpu.memory_space<vmem>>, %arg13: memref<8x32xf32, #tpu.memory_space<vmem>>) attributes {dimension_semantics = [#tpu.dimension_semantics<parallel>, #tpu.dimension_semantics<arbitrary>], iteration_bounds = array<i64: 2, 1>, scalar_prefetch = 0 : i64, scratch_operands = 2 : i64, tpu.core_type = #tpu.core_type<tc>, window_params = [{transform_indices = @transform_0, window_bounds = array<i64: 1, 8, 32>}, {pipeline_mode = #tpu.pipeline_mode<synchronous>, transform_indices = @transform_1, window_bounds = array<i64: 32, 32>}, {pipeline_mode = #tpu.pipeline_mode<synchronous>, transform_indices = @transform_2, window_bounds = array<i64: 1, 32>}, {pipeline_mode = #tpu.pipeline_mode<synchronous>, transform_indices = @transform_3, window_bounds = array<i64: 32, 64>}, {pipeline_mode = #tpu.pipeline_mode<synchronous>, transform_indices = @transform_4, window_bounds = array<i64: 1, 64>}, {pipeline_mode = #tpu.pipeline_mode<synchronous>, transform_indices = @transform_5, window_bounds = array<i64: 32, 32>}, {pipeline_mode = #tpu.pipeline_mode<synchronous>, transform_indices = @transform_6, window_bounds = array<i64: 1, 32>}, {transform_indices = @transform_7, window_bounds = array<i64: 1, 4, 8, 8>}, {transform_indices = @transform_8, window_bounds = array<i64: 1, 8, 32>}, {transform_indices = @transform_9, window_bounds = array<i64: 1, 4, 8, 8>}]} {
    %c0_i32 = arith.constant 0 : i32
    %0 = arith.cmpi eq, %arg1, %c0_i32 : i32
    %1 = arith.extui %0 : i1 to i32
    %c0_i32_0 = arith.constant 0 : i32
    %2 = arith.cmpi ne, %1, %c0_i32_0 : i32
    scf.if %2 {
      %c0_82 = arith.constant 0 : index
      %c0_83 = arith.constant 0 : index
      %c0_84 = arith.constant 0 : index
      %126 = vector.load %arg2[%c0_82, %c0_83, %c0_84] : memref<1x8x32xf32, #tpu.memory_space<vmem>>, vector<1x8x32xf32>
      %127 = vector.shape_cast %126 : vector<1x8x32xf32> to vector<8x32xf32>
      %c0_85 = arith.constant 0 : index
      %c0_86 = arith.constant 0 : index
      %128 = vector.load %arg5[%c0_85, %c0_86] : memref<32x64xf32, #tpu.memory_space<vmem>>, vector<32x64xf32>
      %cst_87 = arith.constant dense<0.000000e+00> : vector<8x64xf32>
      %129 = tpu.matmul %127, %128, %cst_87 {dimension_numbers = #tpu.dot_dimension_numbers<[1], [0], [0], [1], [0, 0, 1, 1], [], []>} : vector<8x32xf32>, vector<32x64xf32>, vector<8x64xf32> -> vector<8x64xf32>
      %c0_88 = arith.constant 0 : index
      %c0_89 = arith.constant 0 : index
      %130 = vector.load %arg6[%c0_88, %c0_89] : memref<1x64xf32, #tpu.memory_space<vmem>>, vector<1x64xf32>
      %131 = vector.broadcast %130 : vector<1x64xf32> to vector<8x64xf32>
      %132 = arith.addf %129, %131 : vector<8x64xf32>
      %c0_90 = arith.constant 0 : index
      %c0_91 = arith.constant 0 : index
      %133 = vector.load %arg12[%c0_90, %c0_91] : memref<8x64xf32, #tpu.memory_space<vmem>>, vector<8x64xf32>
      tpu.vector_store %arg12[%c0_90, %c0_91], %132 {strides = array<i32>} : memref<8x64xf32, #tpu.memory_space<vmem>>, vector<8x64xf32>,
    } else {
    }
    %c8_i32 = arith.constant 8 : i32
    %3 = arith.muli %arg1, %c8_i32 : i32
    %4 = tpu.assume_multiple %3, 8 : i32
    %c0 = arith.constant 0 : index
    %5 = arith.index_cast %4 : i32 to index
    %c0_1 = arith.constant 0 : index
    %6 = vector.load %arg2[%c0, %5, %c0_1] : memref<1x8x32xf32, #tpu.memory_space<vmem>>, vector<1x8x32xf32>
    %7 = vector.shape_cast %6 : vector<1x8x32xf32> to vector<8x32xf32>
    %c0_2 = arith.constant 0 : index
    %c0_3 = arith.constant 0 : index
    %8 = vector.load %arg3[%c0_2, %c0_3] : memref<32x32xf32, #tpu.memory_space<vmem>>, vector<32x32xf32>
    %cst = arith.constant dense<0.000000e+00> : vector<8x32xf32>
    %9 = tpu.matmul %7, %8, %cst {dimension_numbers = #tpu.dot_dimension_numbers<[1], [0], [0], [1], [0, 0, 1, 1], [], []>} : vector<8x32xf32>, vector<32x32xf32>, vector<8x32xf32> -> vector<8x32xf32>
    %c0_4 = arith.constant 0 : index
    %c0_5 = arith.constant 0 : index
    %10 = vector.load %arg4[%c0_4, %c0_5] : memref<1x32xf32, #tpu.memory_space<vmem>>, vector<1x32xf32>
    %11 = vector.broadcast %10 : vector<1x32xf32> to vector<8x32xf32>
    %12 = arith.addf %9, %11 : vector<8x32xf32>
    %13 = vector.extract_strided_slice %12 {offsets = [0, 0], sizes = [8, 8], strides = [1, 1]} : vector<8x32xf32> to vector<8x8xf32>
    %c0_6 = arith.constant 0 : index
    %c0_7 = arith.constant 0 : index
    %14 = vector.load %arg12[%c0_6, %c0_7] : memref<8x64xf32, #tpu.memory_space<vmem>>, vector<8x8xf32>
    %c0_8 = arith.constant 0 : index
    %c32 = arith.constant 32 : index
    %15 = vector.load %arg12[%c0_8, %c32] : memref<8x64xf32, #tpu.memory_space<vmem>>, vector<8x8xf32>
    %cst_9 = arith.constant dense<0.000000e+00> : vector<8x8xf32>
    %16 = tpu.matmul %13, %14, %cst_9 {dimension_numbers = #tpu.dot_dimension_numbers<[1], [1], [0], [0], [0, 0, 1, 0], [], []>} : vector<8x8xf32>, vector<8x8xf32>, vector<8x8xf32> -> vector<8x8xf32>
    %c0_10 = arith.constant 0 : index
    %c0_11 = arith.constant 0 : index
    %c0_12 = arith.constant 0 : index
    %c0_13 = arith.constant 0 : index
    %17 = vector.load %arg9[%c0_10, %c0_11, %c0_12, %c0_13] : memref<1x4x8x8xf32, #tpu.memory_space<vmem>>, vector<1x1x8x8xf32>
    %18 = vector.shape_cast %17 : vector<1x1x8x8xf32> to vector<8x8xf32>
    %19 = arith.addf %16, %18 : vector<8x8xf32>
    %cst_14 = arith.constant dense<0xFF800000> : vector<8xf32>
    %20 = vector.multi_reduction <maximumf>, %19, %cst_14 [1] : vector<8x8xf32> to vector<8xf32>
    %21 = vector.shape_cast %20 : vector<8xf32> to vector<8x1xf32>
    %22 = vector.broadcast %21 : vector<8x1xf32> to vector<8x8xf32>
    %23 = arith.subf %19, %22 : vector<8x8xf32>
    %24 = math.exp %23 : vector<8x8xf32>
    %cst_15 = arith.constant dense<0.000000e+00> : vector<8xf32>
    %25 = vector.multi_reduction <add>, %24, %cst_15 [1] : vector<8x8xf32> to vector<8xf32>
    %26 = vector.shape_cast %25 : vector<8xf32> to vector<8x1xf32>
    %27 = tpu.reciprocal %26 {approx = true} : vector<8x1xf32> -> vector<8x1xf32>
    %28 = arith.mulf %26, %27 : vector<8x1xf32>
    %cst_16 = arith.constant 2.000000e+00 : f32
    %29 = vector.broadcast %cst_16 : f32 to vector<8x1xf32>
    %30 = arith.subf %29, %28 : vector<8x1xf32>
    %31 = arith.mulf %27, %30 : vector<8x1xf32>
    %32 = vector.broadcast %31 : vector<8x1xf32> to vector<8x8xf32>
    %33 = arith.mulf %24, %32 : vector<8x8xf32>
    %c0_17 = arith.constant 0 : index
    %c0_18 = arith.constant 0 : index
    %c0_19 = arith.constant 0 : index
    %c0_20 = arith.constant 0 : index
    %34 = vector.load %arg11[%c0_17, %c0_18, %c0_19, %c0_20] : memref<1x4x8x8xf32, #tpu.memory_space<vmem>>, vector<1x1x8x8xf32>
    %35 = vector.shape_cast %34 : vector<1x1x8x8xf32> to vector<8x8xf32>
    %36 = vector.shape_cast %33 : vector<8x8xf32> to vector<1x1x8x8xf32>
    tpu.vector_store %arg11[%c0_17, %c0_18, %c0_19, %c0_20], %36 {strides = array<i32>} : memref<1x4x8x8xf32, #tpu.memory_space<vmem>>, vector<1x1x8x8xf32>,
    %cst_21 = arith.constant dense<0.000000e+00> : vector<8x8xf32>
    %37 = tpu.matmul %33, %15, %cst_21 {dimension_numbers = #tpu.dot_dimension_numbers<[1], [0], [0], [1], [0, 0, 1, 1], [], []>} : vector<8x8xf32>, vector<8x8xf32>, vector<8x8xf32> -> vector<8x8xf32>
    %c0_22 = arith.constant 0 : index
    %c0_23 = arith.constant 0 : index
    %38 = vector.load %arg13[%c0_22, %c0_23] : memref<8x32xf32, #tpu.memory_space<vmem>>, vector<8x8xf32>
    tpu.vector_store %arg13[%c0_22, %c0_23], %37 {strides = array<i32>} : memref<8x32xf32, #tpu.memory_space<vmem>>, vector<8x8xf32>,
    %39 = vector.extract_strided_slice %12 {offsets = [0, 8], sizes = [8, 8], strides = [1, 1]} : vector<8x32xf32> to vector<8x8xf32>
    %c0_24 = arith.constant 0 : index
    %c8 = arith.constant 8 : index
    %40 = vector.load %arg12[%c0_24, %c8] : memref<8x64xf32, #tpu.memory_space<vmem>>, vector<8x8xf32>
    %c0_25 = arith.constant 0 : index
    %c40 = arith.constant 40 : index
    %41 = vector.load %arg12[%c0_25, %c40] : memref<8x64xf32, #tpu.memory_space<vmem>>, vector<8x8xf32>
    %cst_26 = arith.constant dense<0.000000e+00> : vector<8x8xf32>
    %42 = tpu.matmul %39, %40, %cst_26 {dimension_numbers = #tpu.dot_dimension_numbers<[1], [1], [0], [0], [0, 0, 1, 0], [], []>} : vector<8x8xf32>, vector<8x8xf32>, vector<8x8xf32> -> vector<8x8xf32>
    %c0_27 = arith.constant 0 : index
    %c1 = arith.constant 1 : index
    %c0_28 = arith.constant 0 : index
    %c0_29 = arith.constant 0 : index
    %43 = vector.load %arg9[%c0_27, %c1, %c0_28, %c0_29] : memref<1x4x8x8xf32, #tpu.memory_space<vmem>>, vector<1x1x8x8xf32>
    %44 = vector.shape_cast %43 : vector<1x1x8x8xf32> to vector<8x8xf32>
    %45 = arith.addf %42, %44 : vector<8x8xf32>
    %cst_30 = arith.constant dense<0xFF800000> : vector<8xf32>
    %46 = vector.multi_reduction <maximumf>, %45, %cst_30 [1] : vector<8x8xf32> to vector<8xf32>
    %47 = vector.shape_cast %46 : vector<8xf32> to vector<8x1xf32>
    %48 = vector.broadcast %47 : vector<8x1xf32> to vector<8x8xf32>
    %49 = arith.subf %45, %48 : vector<8x8xf32>
    %50 = math.exp %49 : vector<8x8xf32>
    %cst_31 = arith.constant dense<0.000000e+00> : vector<8xf32>
    %51 = vector.multi_reduction <add>, %50, %cst_31 [1] : vector<8x8xf32> to vector<8xf32>
    %52 = vector.shape_cast %51 : vector<8xf32> to vector<8x1xf32>
    %53 = tpu.reciprocal %52 {approx = true} : vector<8x1xf32> -> vector<8x1xf32>
    %54 = arith.mulf %52, %53 : vector<8x1xf32>
    %cst_32 = arith.constant 2.000000e+00 : f32
    %55 = vector.broadcast %cst_32 : f32 to vector<8x1xf32>
    %56 = arith.subf %55, %54 : vector<8x1xf32>
    %57 = arith.mulf %53, %56 : vector<8x1xf32>
    %58 = vector.broadcast %57 : vector<8x1xf32> to vector<8x8xf32>
    %59 = arith.mulf %50, %58 : vector<8x8xf32>
    %c0_33 = arith.constant 0 : index
    %c1_34 = arith.constant 1 : index
    %c0_35 = arith.constant 0 : index
    %c0_36 = arith.constant 0 : index
    %60 = vector.load %arg11[%c0_33, %c1_34, %c0_35, %c0_36] : memref<1x4x8x8xf32, #tpu.memory_space<vmem>>, vector<1x1x8x8xf32>
    %61 = vector.shape_cast %60 : vector<1x1x8x8xf32> to vector<8x8xf32>
    %62 = vector.shape_cast %59 : vector<8x8xf32> to vector<1x1x8x8xf32>
    tpu.vector_store %arg11[%c0_33, %c1_34, %c0_35, %c0_36], %62 {strides = array<i32>} : memref<1x4x8x8xf32, #tpu.memory_space<vmem>>, vector<1x1x8x8xf32>,
    %cst_37 = arith.constant dense<0.000000e+00> : vector<8x8xf32>
    %63 = tpu.matmul %59, %41, %cst_37 {dimension_numbers = #tpu.dot_dimension_numbers<[1], [0], [0], [1], [0, 0, 1, 1], [], []>} : vector<8x8xf32>, vector<8x8xf32>, vector<8x8xf32> -> vector<8x8xf32>
    %c0_38 = arith.constant 0 : index
    %c8_39 = arith.constant 8 : index
    %64 = vector.load %arg13[%c0_38, %c8_39] : memref<8x32xf32, #tpu.memory_space<vmem>>, vector<8x8xf32>
    tpu.vector_store %arg13[%c0_38, %c8_39], %63 {strides = array<i32>} : memref<8x32xf32, #tpu.memory_space<vmem>>, vector<8x8xf32>,
    %65 = vector.extract_strided_slice %12 {offsets = [0, 16], sizes = [8, 8], strides = [1, 1]} : vector<8x32xf32> to vector<8x8xf32>
    %c0_40 = arith.constant 0 : index
    %c16 = arith.constant 16 : index
    %66 = vector.load %arg12[%c0_40, %c16] : memref<8x64xf32, #tpu.memory_space<vmem>>, vector<8x8xf32>
    %c0_41 = arith.constant 0 : index
    %c48 = arith.constant 48 : index
    %67 = vector.load %arg12[%c0_41, %c48] : memref<8x64xf32, #tpu.memory_space<vmem>>, vector<8x8xf32>
    %cst_42 = arith.constant dense<0.000000e+00> : vector<8x8xf32>
    %68 = tpu.matmul %65, %66, %cst_42 {dimension_numbers = #tpu.dot_dimension_numbers<[1], [1], [0], [0], [0, 0, 1, 0], [], []>} : vector<8x8xf32>, vector<8x8xf32>, vector<8x8xf32> -> vector<8x8xf32>
    %c0_43 = arith.constant 0 : index
    %c2 = arith.constant 2 : index
    %c0_44 = arith.constant 0 : index
    %c0_45 = arith.constant 0 : index
    %69 = vector.load %arg9[%c0_43, %c2, %c0_44, %c0_45] : memref<1x4x8x8xf32, #tpu.memory_space<vmem>>, vector<1x1x8x8xf32>
    %70 = vector.shape_cast %69 : vector<1x1x8x8xf32> to vector<8x8xf32>
    %71 = arith.addf %68, %70 : vector<8x8xf32>
    %cst_46 = arith.constant dense<0xFF800000> : vector<8xf32>
    %72 = vector.multi_reduction <maximumf>, %71, %cst_46 [1] : vector<8x8xf32> to vector<8xf32>
    %73 = vector.shape_cast %72 : vector<8xf32> to vector<8x1xf32>
    %74 = vector.broadcast %73 : vector<8x1xf32> to vector<8x8xf32>
    %75 = arith.subf %71, %74 : vector<8x8xf32>
    %76 = math.exp %75 : vector<8x8xf32>
    %cst_47 = arith.constant dense<0.000000e+00> : vector<8xf32>
    %77 = vector.multi_reduction <add>, %76, %cst_47 [1] : vector<8x8xf32> to vector<8xf32>
    %78 = vector.shape_cast %77 : vector<8xf32> to vector<8x1xf32>
    %79 = tpu.reciprocal %78 {approx = true} : vector<8x1xf32> -> vector<8x1xf32>
    %80 = arith.mulf %78, %79 : vector<8x1xf32>
    %cst_48 = arith.constant 2.000000e+00 : f32
    %81 = vector.broadcast %cst_48 : f32 to vector<8x1xf32>
    %82 = arith.subf %81, %80 : vector<8x1xf32>
    %83 = arith.mulf %79, %82 : vector<8x1xf32>
    %84 = vector.broadcast %83 : vector<8x1xf32> to vector<8x8xf32>
    %85 = arith.mulf %76, %84 : vector<8x8xf32>
    %c0_49 = arith.constant 0 : index
    %c2_50 = arith.constant 2 : index
    %c0_51 = arith.constant 0 : index
    %c0_52 = arith.constant 0 : index
    %86 = vector.load %arg11[%c0_49, %c2_50, %c0_51, %c0_52] : memref<1x4x8x8xf32, #tpu.memory_space<vmem>>, vector<1x1x8x8xf32>
    %87 = vector.shape_cast %86 : vector<1x1x8x8xf32> to vector<8x8xf32>
    %88 = vector.shape_cast %85 : vector<8x8xf32> to vector<1x1x8x8xf32>
    tpu.vector_store %arg11[%c0_49, %c2_50, %c0_51, %c0_52], %88 {strides = array<i32>} : memref<1x4x8x8xf32, #tpu.memory_space<vmem>>, vector<1x1x8x8xf32>,
    %cst_53 = arith.constant dense<0.000000e+00> : vector<8x8xf32>
    %89 = tpu.matmul %85, %67, %cst_53 {dimension_numbers = #tpu.dot_dimension_numbers<[1], [0], [0], [1], [0, 0, 1, 1], [], []>} : vector<8x8xf32>, vector<8x8xf32>, vector<8x8xf32> -> vector<8x8xf32>
    %c0_54 = arith.constant 0 : index
    %c16_55 = arith.constant 16 : index
    %90 = vector.load %arg13[%c0_54, %c16_55] : memref<8x32xf32, #tpu.memory_space<vmem>>, vector<8x8xf32>
    tpu.vector_store %arg13[%c0_54, %c16_55], %89 {strides = array<i32>} : memref<8x32xf32, #tpu.memory_space<vmem>>, vector<8x8xf32>,
    %91 = vector.extract_strided_slice %12 {offsets = [0, 24], sizes = [8, 8], strides = [1, 1]} : vector<8x32xf32> to vector<8x8xf32>
    %c0_56 = arith.constant 0 : index
    %c24 = arith.constant 24 : index
    %92 = vector.load %arg12[%c0_56, %c24] : memref<8x64xf32, #tpu.memory_space<vmem>>, vector<8x8xf32>
    %c0_57 = arith.constant 0 : index
    %c56 = arith.constant 56 : index
    %93 = vector.load %arg12[%c0_57, %c56] : memref<8x64xf32, #tpu.memory_space<vmem>>, vector<8x8xf32>
    %cst_58 = arith.constant dense<0.000000e+00> : vector<8x8xf32>
    %94 = tpu.matmul %91, %92, %cst_58 {dimension_numbers = #tpu.dot_dimension_numbers<[1], [1], [0], [0], [0, 0, 1, 0], [], []>} : vector<8x8xf32>, vector<8x8xf32>, vector<8x8xf32> -> vector<8x8xf32>
    %c0_59 = arith.constant 0 : index
    %c3 = arith.constant 3 : index
    %c0_60 = arith.constant 0 : index
    %c0_61 = arith.constant 0 : index
    %95 = vector.load %arg9[%c0_59, %c3, %c0_60, %c0_61] : memref<1x4x8x8xf32, #tpu.memory_space<vmem>>, vector<1x1x8x8xf32>
    %96 = vector.shape_cast %95 : vector<1x1x8x8xf32> to vector<8x8xf32>
    %97 = arith.addf %94, %96 : vector<8x8xf32>
    %cst_62 = arith.constant dense<0xFF800000> : vector<8xf32>
    %98 = vector.multi_reduction <maximumf>, %97, %cst_62 [1] : vector<8x8xf32> to vector<8xf32>
    %99 = vector.shape_cast %98 : vector<8xf32> to vector<8x1xf32>
    %100 = vector.broadcast %99 : vector<8x1xf32> to vector<8x8xf32>
    %101 = arith.subf %97, %100 : vector<8x8xf32>
    %102 = math.exp %101 : vector<8x8xf32>
    %cst_63 = arith.constant dense<0.000000e+00> : vector<8xf32>
    %103 = vector.multi_reduction <add>, %102, %cst_63 [1] : vector<8x8xf32> to vector<8xf32>
    %104 = vector.shape_cast %103 : vector<8xf32> to vector<8x1xf32>
    %105 = tpu.reciprocal %104 {approx = true} : vector<8x1xf32> -> vector<8x1xf32>
    %106 = arith.mulf %104, %105 : vector<8x1xf32>
    %cst_64 = arith.constant 2.000000e+00 : f32
    %107 = vector.broadcast %cst_64 : f32 to vector<8x1xf32>
    %108 = arith.subf %107, %106 : vector<8x1xf32>
    %109 = arith.mulf %105, %108 : vector<8x1xf32>
    %110 = vector.broadcast %109 : vector<8x1xf32> to vector<8x8xf32>
    %111 = arith.mulf %102, %110 : vector<8x8xf32>
    %c0_65 = arith.constant 0 : index
    %c3_66 = arith.constant 3 : index
    %c0_67 = arith.constant 0 : index
    %c0_68 = arith.constant 0 : index
    %112 = vector.load %arg11[%c0_65, %c3_66, %c0_67, %c0_68] : memref<1x4x8x8xf32, #tpu.memory_space<vmem>>, vector<1x1x8x8xf32>
    %113 = vector.shape_cast %112 : vector<1x1x8x8xf32> to vector<8x8xf32>
    %114 = vector.shape_cast %111 : vector<8x8xf32> to vector<1x1x8x8xf32>
    tpu.vector_store %arg11[%c0_65, %c3_66, %c0_67, %c0_68], %114 {strides = array<i32>} : memref<1x4x8x8xf32, #tpu.memory_space<vmem>>, vector<1x1x8x8xf32>,
    %cst_69 = arith.constant dense<0.000000e+00> : vector<8x8xf32>
    %115 = tpu.matmul %111, %93, %cst_69 {dimension_numbers = #tpu.dot_dimension_numbers<[1], [0], [0], [1], [0, 0, 1, 1], [], []>} : vector<8x8xf32>, vector<8x8xf32>, vector<8x8xf32> -> vector<8x8xf32>
    %c0_70 = arith.constant 0 : index
    %c24_71 = arith.constant 24 : index
    %116 = vector.load %arg13[%c0_70, %c24_71] : memref<8x32xf32, #tpu.memory_space<vmem>>, vector<8x8xf32>
    tpu.vector_store %arg13[%c0_70, %c24_71], %115 {strides = array<i32>} : memref<8x32xf32, #tpu.memory_space<vmem>>, vector<8x8xf32>,
    %c0_72 = arith.constant 0 : index
    %c0_73 = arith.constant 0 : index
    %117 = vector.load %arg13[%c0_72, %c0_73] : memref<8x32xf32, #tpu.memory_space<vmem>>, vector<8x32xf32>
    %c0_74 = arith.constant 0 : index
    %c0_75 = arith.constant 0 : index
    %118 = vector.load %arg7[%c0_74, %c0_75] : memref<32x32xf32, #tpu.memory_space<vmem>>, vector<32x32xf32>
    %cst_76 = arith.constant dense<0.000000e+00> : vector<8x32xf32>
    %119 = tpu.matmul %117, %118, %cst_76 {dimension_numbers = #tpu.dot_dimension_numbers<[1], [0], [0], [1], [0, 0, 1, 1], [], []>} : vector<8x32xf32>, vector<32x32xf32>, vector<8x32xf32> -> vector<8x32xf32>
    %c0_77 = arith.constant 0 : index
    %c0_78 = arith.constant 0 : index
    %120 = vector.load %arg8[%c0_77, %c0_78] : memref<1x32xf32, #tpu.memory_space<vmem>>, vector<1x32xf32>
    %121 = vector.broadcast %120 : vector<1x32xf32> to vector<8x32xf32>
    %122 = arith.addf %119, %121 : vector<8x32xf32>
    %c0_79 = arith.constant 0 : index
    %c0_80 = arith.constant 0 : index
    %c0_81 = arith.constant 0 : index
    %123 = vector.load %arg10[%c0_79, %c0_80, %c0_81] : memref<1x8x32xf32, #tpu.memory_space<vmem>>, vector<1x8x32xf32>
    %124 = vector.shape_cast %123 : vector<1x8x32xf32> to vector<8x32xf32>
    %125 = vector.shape_cast %122 : vector<8x32xf32> to vector<1x8x32xf32>
    tpu.vector_store %arg10[%c0_79, %c0_80, %c0_81], %125 {strides = array<i32>} : memref<1x8x32xf32, #tpu.memory_space<vmem>>, vector<1x8x32xf32>,
    return
  }
  func.func @transform_0(%arg0: i32, %arg1: i32) -> (i32, i32, i32) {
    %c0_i32 = arith.constant 0 : i32
    %c0_i32_0 = arith.constant 0 : i32
    %c0_i32_1 = arith.constant 0 : i32
    return %arg0, %c0_i32, %c0_i32_0 : i32, i32, i32
  }
  func.func @transform_1(%arg0: i32, %arg1: i32) -> (i32, i32) {
    %c0_i32 = arith.constant 0 : i32
    %c0_i32_0 = arith.constant 0 : i32
    %c0_i32_1 = arith.constant 0 : i32
    return %c0_i32, %c0_i32_0 : i32, i32
  }
  func.func @transform_2(%arg0: i32, %arg1: i32) -> (i32, i32) {
    %c0_i32 = arith.constant 0 : i32
    %c0_i32_0 = arith.constant 0 : i32
    %c0_i32_1 = arith.constant 0 : i32
    return %c0_i32, %c0_i32_0 : i32, i32
  }
  func.func @transform_3(%arg0: i32, %arg1: i32) -> (i32, i32) {
    %c0_i32 = arith.constant 0 : i32
    %c0_i32_0 = arith.constant 0 : i32
    %c0_i32_1 = arith.constant 0 : i32
    return %c0_i32, %c0_i32_0 : i32, i32
  }
  func.func @transform_4(%arg0: i32, %arg1: i32) -> (i32, i32) {
    %c0_i32 = arith.constant 0 : i32
    %c0_i32_0 = arith.constant 0 : i32
    %c0_i32_1 = arith.constant 0 : i32
    return %c0_i32, %c0_i32_0 : i32, i32
  }
  func.func @transform_5(%arg0: i32, %arg1: i32) -> (i32, i32) {
    %c0_i32 = arith.constant 0 : i32
    %c0_i32_0 = arith.constant 0 : i32
    %c0_i32_1 = arith.constant 0 : i32
    return %c0_i32, %c0_i32_0 : i32, i32
  }
  func.func @transform_6(%arg0: i32, %arg1: i32) -> (i32, i32) {
    %c0_i32 = arith.constant 0 : i32
    %c0_i32_0 = arith.constant 0 : i32
    %c0_i32_1 = arith.constant 0 : i32
    return %c0_i32, %c0_i32_0 : i32, i32
  }
  func.func @transform_7(%arg0: i32, %arg1: i32) -> (i32, i32, i32, i32) {
    %c0_i32 = arith.constant 0 : i32
    %c0_i32_0 = arith.constant 0 : i32
    %c0_i32_1 = arith.constant 0 : i32
    return %arg0, %c0_i32, %arg1, %c0_i32_0 : i32, i32, i32, i32
  }
  func.func @transform_8(%arg0: i32, %arg1: i32) -> (i32, i32, i32) {
    %c0_i32 = arith.constant 0 : i32
    %c0_i32_0 = arith.constant 0 : i32
    return %arg0, %arg1, %c0_i32 : i32, i32, i32
  }
  func.func @transform_9(%arg0: i32, %arg1: i32) -> (i32, i32, i32, i32) {
    %c0_i32 = arith.constant 0 : i32
    %c0_i32_0 = arith.constant 0 : i32
    %c0_i32_1 = arith.constant 0 : i32
    return %arg0, %c0_i32, %arg1, %c0_i32_0 : i32, i32, i32, i32
  }
}

</mosaic_0001>

<bundles_post_ra>
// kernel: tpu_custom_call.1
= control target key start
LH: loop header
LB: loop body
LE: loop exit
PB: predicated region body
PF: predicated region fallthrough
CT: control target
= control target key end

     0   :  { %s3019_s0 = inlined_call_operand.hbm [shape: f32[2,8,32], index: 0, kind: input, shape index: {}]   ;;  %s3020_s1 = inlined_call_operand.hbm [shape: f32[32,32], index: 1, kind: input, shape index: {}]   ;;  %s3021_s2 = inlined_call_operand.hbm [shape: f32[1,32], index: 2, kind: input, shape index: {}]   ;;  %s3022_s3 = inlined_call_operand.hbm [shape: f32[32,64], index: 3, kind: input, shape index: {}]   ;;  %s3023_s4 = inlined_call_operand.hbm [shape: f32[1,64], index: 4, kind: input, shape index: {}]   ;;  %s3024_s5 = inlined_call_operand.hbm [shape: f32[32,32], index: 5, kind: input, shape index: {}]   ;;  %s3025_s6 = inlined_call_operand.hbm [shape: f32[1,32], index: 6, kind: input, shape index: {}]   ;;  %s3026_s7 = inlined_call_operand.hbm [shape: f32[2,4,8,8], index: 7, kind: input, shape index: {}]   ;;  %s3027_s8 = inlined_call_operand.hbm [shape: f32[2,8,32], index: 8, kind: output, shape index: {0}]   ;;  %s3028_s9 = inlined_call_operand.hbm [shape: f32[2,4,8,8], index: 9, kind: output, shape index: {1}]  }
   0x1   :  { %3039 = sst [smem:[#allocation29_spill]] %s3019_s0 }
   0x2   :  { %3040 = sst [smem:[#allocation30_spill]] %s3020_s1 }
   0x3   :  { %3041 = sst [smem:[#allocation31_spill]] %s3021_s2 }
   0x4   :  { %3042 = sst [smem:[#allocation32_spill]] %s3027_s8 }
   0x5   :  { %3043 = sst [smem:[#allocation33_spill]] %s3028_s9 }
   0x6   :  { %15 = vsyncpa [#allocation5], 0 }
   0x7   :  { %17 = vsyncpa [#allocation5 + $0x1], 0 }
   0x8   :  { %18 = vsyncpa [#allocation8], 0 }
   0x9   :  { %19 = vsyncpa [#allocation11], 0 }
   0xa   :  { %20 = vsyncpa [#allocation14], 0 }
   0xb   :  { %21 = vsyncpa [#allocation17], 0 }
   0xc   :  { %23 = vsyncpa [#allocation17 + $0x1], 0 }
   0xd   :  { %24 = vsyncpa [#allocation6], 0 }
   0xe   :  { %26 = vsyncpa [#allocation6 + $0x1], 0 }
   0xf   :  { %27 = vsyncpa [#allocation20], 0 }
  0x10   :  { %29 = vsyncpa [#allocation20 + $0x1], 0  ;;  %s2492_s30 = smov 0   ;;  %s2494_s10 = smov 0  }
  0x11   :  { %s2496_s11 = smov 0   ;;  %s2498_s12 = smov 0  }
  0x12   :  { %s2500_s13 = smov 0   ;;  %s2502_s14 = smov 0  }
  0x13 LB: > { %3044 = sst [smem:[#allocation28_spill]] %s2406_s12  ;;  %s3029_s15 = sadd.s32 4294967295, %s2414_s14   ;;  %s2414_s14 = sphi %s2502_s14, %s35_s14   ;;  %s2410_s13 = sphi %s2500_s13, %s3074_s13   ;;  %s2406_s12 = sphi %s2498_s12, %s3073_s12   ;;  %s2402_s11 = sphi %s2496_s11, %s3072_s11   ;;  %s2398_s10 = sphi %s2494_s10, %s3071_s10   ;;  %s2394_s30 = sphi %s2492_s30, %s3070_s30  }
  0x14   : > { %p1712_p0 = scmp.ge.s32.totalorder %s2414_s14, 1  ;;  %p2526_p1 = scmp.eq.s32.totalorder %s3029_s15, 0 }
  0x15   : > { %p288_p2 = scmp.lt.s32.totalorder %s2414_s14, 3  ;;  %s2416_s18 = smov [#allocation7]  }
  0x16   : > { %s3045_s16 = scalar_select %p2526_p1, 1, 0 }
  0x17   : > { %p2531_p3 = pnand %p1712_p0, %p288_p2  ;;  %s300_s19 = sshll.u32 %s2416_s18, 4  ;;  %s2535_s19 = int_to_ptr.vmem [resolvable:$true] %s300_s19 }
  0x18   : > { %s2417_s21 = smov [#allocation10]   ;;  %s2418_s23 = smov [#allocation13]  }
  0x19   : > { %s3046_s17 = scalar_select %p2531_p3, 1, 0 }
  0x1a   : > { %p1923_p4 = pneg %p2531_p3  ;;  %s324_s22 = sshll.u32 %s2417_s21, 4  ;;  %s2546_s22 = int_to_ptr.vmem [resolvable:$true] %s324_s22 }
  0x1b   : > { %s2548_s24 = sshll.u32 %s2418_s23, 4  ;;  %s3048_s1 = sld [smem:[#allocation30_spill]]  ;;  %s349_s24 = int_to_ptr.vmem [resolvable:$true] %s2548_s24 }
  0x1c   : > { %p2542_p6 = pnand %p1923_p4, %p2526_p1 }
  0x1e   : > { %p2558_p8 = pneg %p2542_p6 }
  0x21   : > { %s2056_s27 = scalar_lea.hbm %s3048_s1, 512 }
  0x22   : > { %p2057_p7 = scmp.ne.s32.totalorder %s3048_s1, %s2056_s27  ;;  %p2063_p11 = scmp.lt.u32.totalorder %s2056_s27, %s3048_s1 }
  0x24   : > { %p2059_p9 = pnand %p2558_p8, %p2057_p7 }
  0x26   : > { %p2060_p10 = pneg %p2059_p9 }
  0x28   : > { %p2065_p12 = pnand %p2063_p11, %p2060_p10 }
  0x2a   : > { %2068 = shalt.err (!%p2065_p12)
}
  0x2b   : > { %s2069_s25 = scalar_lea.vmem %s2535_s19, 512  ;;  %p2077_p4 = scmp.lt.s32.totalorder %s2535_s19, %s2535_s19 }
  0x2c   : > { %p2070_p13 = scmp.ne.s32.totalorder %s2535_s19, %s2069_s25  ;;  %p2078_p5 = scmp.lt.s32.totalorder %s2069_s25, %s2069_s25 }
  0x2e   : > { %p2072_p0 = pnand %p2070_p13, %p2558_p8  ;;  %p2079_p7 = por %p2078_p5, %p2077_p4 }
  0x30   : > { %p2073_p2 = pneg %p2072_p0 }
  0x32   : > { %p2080_p9 = pnand %p2079_p7, %p2073_p2 }
  0x34   : > { %2083 = shalt.err (!%p2080_p9)
}
  0x35   : > { %s3036_s26 = smov 128   ;;  %s3037_s27 = smov 8  }
  0x36   : > { %1926 = dma.hbm_to_vmem [thread:$0]  (!%p2542_p6), %s3048_s1, 512, %s2535_s19, [#allocation8], %s3036_s26, %s3036_s26, %s3037_s27  }
  0x37   : > { %s2084_s25 = scalar_lea.hbm %s3022_s3, 512 }
  0x38   : > { %p2085_p5 = scmp.ne.s32.totalorder %s3022_s3, %s2084_s25  ;;  %p2091_p12 = scmp.lt.u32.totalorder %s2084_s25, %s3022_s3 }
  0x3a   : > { %p2087_p10 = pnand %p2085_p5, %p2558_p8 }
  0x3c   : > { %p2088_p11 = pneg %p2087_p10 }
  0x3e   : > { %p2093_p13 = pnand %p2091_p12, %p2088_p11 }
  0x40   : > { %2096 = shalt.err (!%p2093_p13)
}
  0x41   : > { %s2097_s19 = scalar_lea.vmem %s2546_s22, 512  ;;  %p2105_p7 = scmp.lt.s32.totalorder %s2546_s22, %s2546_s22 }
  0x42   : > { %p2098_p0 = scmp.ne.s32.totalorder %s2546_s22, %s2097_s19  ;;  %p2106_p9 = scmp.lt.s32.totalorder %s2097_s19, %s2097_s19 }
  0x44   : > { %p2100_p2 = pnand %p2098_p0, %p2558_p8  ;;  %p2107_p5 = por %p2106_p9, %p2105_p7 }
  0x46   : > { %p2101_p4 = pneg %p2100_p2 }
  0x48   : > { %p2108_p10 = pnand %p2107_p5, %p2101_p4 }
  0x4a   : > { %2111 = shalt.err (!%p2108_p10)
}
  0x4b   : > { %1932 = dma.hbm_to_vmem [thread:$0]  (!%p2542_p6), %s3022_s3, 512, %s2546_s22, [#allocation11], %s3036_s26, %s3036_s26, %s3037_s27  }
  0x4c   : > { %s2112_s28 = scalar_lea.hbm %s3024_s5, 512 }
  0x4d   : > { %p2113_p11 = scmp.ne.s32.totalorder %s3024_s5, %s2112_s28  ;;  %p2119_p0 = scmp.lt.u32.totalorder %s2112_s28, %s3024_s5 }
  0x4f   : > { %p2115_p12 = pnand %p2113_p11, %p2558_p8 }
  0x51   : > { %p2116_p13 = pneg %p2115_p12 }
  0x53   : > { %p2121_p2 = pnand %p2119_p0, %p2116_p13 }
  0x55   : > { %2124 = shalt.err (!%p2121_p2)
}
  0x56   : > { %s2125_s19 = scalar_lea.vmem %s349_s24, 512  ;;  %p2133_p5 = scmp.lt.s32.totalorder %s349_s24, %s349_s24 }
  0x57   : > { %p2126_p4 = scmp.ne.s32.totalorder %s349_s24, %s2125_s19  ;;  %p2134_p10 = scmp.lt.s32.totalorder %s2125_s19, %s2125_s19 }
  0x59   : > { %p2128_p7 = pnand %p2126_p4, %p2558_p8  ;;  %p2135_p3 = por %p2134_p10, %p2133_p5 }
  0x5b   : > { %p2129_p9 = pneg %p2128_p7 }
  0x5d   : > { %p2136_p1 = pnand %p2135_p3, %p2129_p9 }
  0x5f   : > { %2139 = shalt.err (!%p2136_p1)
}
  0x60   : > { %1938 = dma.hbm_to_vmem [thread:$0]  (!%p2542_p6), %s3024_s5, 512, %s349_s24, [#allocation14], %s3036_s26, %s3036_s26, %s3037_s27  }
  0x61   : > { %s2421_s9 = smov [#allocation9]   ;;  %s2422_s15 = smov [#allocation12]  }
  0x62   : > { %s314_s12 = sshll.u32 %s2421_s9, 4  ;;  %s338_s28 = sshll.u32 %s2422_s15, 4  ;;  %s315_s12 = int_to_ptr.vmem [resolvable:$true] %s314_s12  ;;  %s339_s28 = int_to_ptr.vmem [resolvable:$true] %s338_s28 }
  0x63   : > { %s3050_s2 = sld [smem:[#allocation31_spill]] }
  0x69   : > { %s2140_s23 = scalar_lea.hbm %s3050_s2, 16 }
  0x6a   : > { %p2141_p1 = scmp.ne.s32.totalorder %s3050_s2, %s2140_s23  ;;  %p2147_p12 = scmp.lt.u32.totalorder %s2140_s23, %s3050_s2 }
  0x6c   : > { %p2143_p3 = pnand %p2141_p1, %p2558_p8 }
  0x6e   : > { %p2144_p11 = pneg %p2143_p3 }
  0x70   : > { %p2149_p13 = pnand %p2147_p12, %p2144_p11 }
  0x72   : > { %2152 = shalt.err (!%p2149_p13)
}
  0x73   : > { %s2153_s24 = scalar_lea.vmem %s315_s12, 16  ;;  %s2160_s8 = scalar_lea.vmem %s315_s12, 32 }
  0x74   : > { %p2154_p0 = scmp.ne.s32.totalorder %s315_s12, %s2153_s24  ;;  %p2161_p7 = scmp.lt.s32.totalorder %s315_s12, %s315_s12 }
  0x75   : > { %p2162_p9 = scmp.lt.s32.totalorder %s2160_s8, %s2153_s24 }
  0x76   : > { %p2156_p2 = pnand %p2154_p0, %p2558_p8 }
  0x77   : > { %p2163_p5 = por %p2162_p9, %p2161_p7 }
  0x78   : > { %p2157_p4 = pneg %p2156_p2 }
  0x7a   : > { %p2164_p10 = pnand %p2163_p5, %p2157_p4 }
  0x7c   : > { %2167 = shalt.err (!%p2164_p10)
}
  0x7d   : > { %1929 = dma.hbm_to_vmem [thread:$0]  (!%p2542_p6), %s3050_s2, 16, %s315_s12, [#allocation8]  }
  0x7e   : > { %s2168_s21 = scalar_lea.hbm %s3023_s4, 16 }
  0x7f   : > { %p2169_p1 = scmp.ne.s32.totalorder %s3023_s4, %s2168_s21  ;;  %p2175_p12 = scmp.lt.u32.totalorder %s2168_s21, %s3023_s4 }
  0x81   : > { %p2171_p3 = pnand %p2169_p1, %p2558_p8 }
  0x83   : > { %p2172_p11 = pneg %p2171_p3 }
  0x85   : > { %p2177_p13 = pnand %p2175_p12, %p2172_p11 }
  0x87   : > { %2180 = shalt.err (!%p2177_p13)
}
  0x88   : > { %s2181_s24 = scalar_lea.vmem %s339_s28, 16  ;;  %s2188_s12 = scalar_lea.vmem %s339_s28, 32 }
  0x89   : > { %p2182_p0 = scmp.ne.s32.totalorder %s339_s28, %s2181_s24  ;;  %p2189_p7 = scmp.lt.s32.totalorder %s339_s28, %s339_s28 }
  0x8a   : > { %p2190_p9 = scmp.lt.s32.totalorder %s2188_s12, %s2181_s24 }
  0x8b   : > { %p2184_p2 = pnand %p2182_p0, %p2558_p8 }
  0x8c   : > { %p2191_p5 = por %p2190_p9, %p2189_p7 }
  0x8d   : > { %p2185_p4 = pneg %p2184_p2 }
  0x8f   : > { %p2192_p10 = pnand %p2191_p5, %p2185_p4 }
  0x91   : > { %2195 = shalt.err (!%p2192_p10)
}
  0x92   : > { %1935 = dma.hbm_to_vmem [thread:$0]  (!%p2542_p6), %s3023_s4, 16, %s339_s28, [#allocation11]  }
  0x93   : > { %s2423_s15 = smov [#allocation15]   ;;  %s2196_s23 = scalar_lea.hbm %s3025_s6, 16 }
  0x94   : > { %s362_s1 = sshll.u32 %s2423_s15, 4  ;;  %p2197_p1 = scmp.ne.s32.totalorder %s3025_s6, %s2196_s23  ;;  %s363_s1 = int_to_ptr.vmem [resolvable:$true] %s362_s1 }
  0x95   : > { %p2203_p12 = scmp.lt.u32.totalorder %s2196_s23, %s3025_s6 }
  0x96   : > { %p2199_p3 = pnand %p2197_p1, %p2558_p8 }
  0x98   : > { %p2200_p11 = pneg %p2199_p3 }
  0x9a   : > { %p2205_p13 = pnand %p2203_p12, %p2200_p11 }
  0x9c   : > { %2208 = shalt.err (!%p2205_p13)
}
  0x9d   : > { %s2209_s28 = scalar_lea.vmem %s363_s1, 16  ;;  %s2216_s12 = scalar_lea.vmem %s363_s1, 32 }
  0x9e   : > { %p2210_p0 = scmp.ne.s32.totalorder %s363_s1, %s2209_s28  ;;  %p2217_p7 = scmp.lt.s32.totalorder %s363_s1, %s363_s1 }
  0x9f   : > { %p2218_p9 = scmp.lt.s32.totalorder %s2216_s12, %s2209_s28 }
  0xa0   : > { %p2212_p2 = pnand %p2210_p0, %p2558_p8 }
  0xa1   : > { %p2219_p5 = por %p2218_p9, %p2217_p7 }
  0xa2   : > { %p2213_p4 = pneg %p2212_p2 }
  0xa4   : > { %p2220_p10 = pnand %p2219_p5, %p2213_p4 }
  0xa6   : > { %2223 = shalt.err (!%p2220_p10)
}
  0xa7   : > { %1941 = dma.hbm_to_vmem [thread:$0]  (!%p2542_p6), %s3025_s6, 16, %s363_s1, [#allocation14]  }
  0xa8   : > { %s1711_s18 = sadd.s32 4294967294, %s2414_s14   ;;  %s47_s15 = sadd.s32 1, %s2410_s13 }
  0xa9   : > { %p49_p8 = scmp.ge.s32.totalorder %s47_s15, 2  ;;  %s54_s20 = sadd.s32 1, %s2402_s11 }
  0xaa   : > { %p61_p1 = scmp.ne.s32.totalorder %s2402_s11, %s2398_s10  ;;  %p62_p3 = scmp.eq.s32.totalorder %s2414_s14, 0 }
  0xab   : > { %s3076_s15 = smov (%p49_p8, %s47_s15), 0  ;;  %p67_p12 = scmp.ne.s32.totalorder %s2398_s10, %s2394_s30 }
  0xac   : > { %p2692_p11 = por %p62_p3, %p61_p1  ;;  %s51_s1 = ssub.s32 %s2410_s13, %s3076_s15 }
  0xad   : > { %s3052_s21 = sadd.s32 4294967295, %s2414_s14   ;;  %p52_p13 = scmp.eq.s32.totalorder %s51_s1, 0 }
  0xae   : > { %p247_p6 = scmp.eq.s32.totalorder %s3052_s21, 1  ;;  %p3053_p0 = scmp.ne.s32.totalorder %s3045_s16, 0 }
  0xaf   : > { %p253_p7 = scmp.eq.s32.totalorder %s1711_s18, 1  ;;  %p1962_p5 = scmp.lt.s32.totalorder %s2414_s14, 2 }
  0xb0   : > { %p2704_p2 = por %p3053_p0, %p67_p12  ;;  %p2708_p4 = por %p247_p6, %p61_p1 }
  0xb1   : > { %s2713_s19 = scalar_select %p52_p13, %s2402_s11, %s54_s20  }
  0xb2   : > { %s3055_s25 = scalar_select %p2708_p4, 1, 0 }
  0xb3   : > { %p2715_p9 = por %p253_p7, %p67_p12  ;;  %s2721_s24 = sand.u32 1, %s2402_s11  }
  0xb4   : > { %s1721_s28 = sshll.u32 %s2410_s13, 7  ;;  %s1720_s12 = sshll.u32 %s2721_s24, 3 }
  0xb5   : > { %s3056_s22 = scalar_select %p2715_p9, 1, 0 }
  0xb6   : > { %s3057_s0 = sld [smem:[#allocation29_spill]]  ;;  %s377_s18 = scalar_lea.vmem [#allocation4], %s1720_s12 }
  0xb7   : > { %s384_s20 = sshll.u32 %s377_s18, 4  ;;  %p2732_p10 = pnand %p1962_p5, %p2692_p11  ;;  %s2736_s20 = int_to_ptr.vmem [resolvable:$true] %s384_s20 }
  0xb8   : > { %s374_s27 = scalar_lea.sflag [#allocation5], %s2721_s24 }
  0xb9   : > { %p2226_p1 = pneg %p2732_p10 }
  0xbc   : > { %s2728_s1 = scalar_lea.hbm %s3057_s0, %s1721_s28  ;;  %s2229_s12 = scalar_lea.hbm %s3057_s0, 256 }
  0xbd   : > { %s2224_s8 = scalar_lea.hbm %s2728_s1, 128  ;;  %p2230_p11 = scmp.lt.u32.totalorder %s2728_s1, %s3057_s0 }
  0xbe   : > { %p2225_p8 = scmp.ne.s32.totalorder %s2728_s1, %s2224_s8  ;;  %p2231_p6 = scmp.lt.u32.totalorder %s2229_s12, %s2224_s8 }
  0xbf   : > { %p2233_p0 = scmp.lt.u32.totalorder %s2224_s8, %s2728_s1 }
  0xc0   : > { %p2227_p3 = pnand %p2226_p1, %p2225_p8  ;;  %p2232_p13 = por %p2231_p6, %p2230_p11 }
  0xc2   : > { %p2228_p12 = pneg %p2227_p3  ;;  %p2234_p7 = por %p2233_p0, %p2232_p13 }
  0xc4   : > { %p2235_p5 = pnand %p2234_p7, %p2228_p12 }
  0xc6   : > { %2238 = shalt.err (!%p2235_p5)
}
  0xc7   : > { %s2239_s26 = scalar_lea.vmem %s2736_s20, 128  ;;  %s2424_s28 = smov [#allocation4]  }
  0xc8   : > { %p2240_p8 = scmp.ne.s32.totalorder %s2736_s20, %s2239_s26  ;;  %s2244_s29 = sshll.u32 %s2424_s28, 4  ;;  %s2245_s29 = int_to_ptr.vmem [resolvable:$false] %s2244_s29 }
  0xc9   : > { %s2246_s9 = scalar_lea.vmem %s2245_s29, 256  ;;  %p2247_p4 = scmp.lt.s32.totalorder %s2736_s20, %s2245_s29 }
  0xca   : > { %p2242_p3 = pnand %p2240_p8, %p2226_p1  ;;  %p2248_p11 = scmp.lt.s32.totalorder %s2246_s9, %s2239_s26 }
  0xcc   : > { %p2243_p9 = pneg %p2242_p3  ;;  %p2249_p6 = por %p2248_p11, %p2247_p4 }
  0xce   : > { %p2250_p13 = pnand %p2249_p6, %p2243_p9 }
  0xd0   : > { %2253 = shalt.err (!%p2250_p13)
}
  0xd1   : > { %1945 = dma.hbm_to_vmem [thread:$0]  (!%p2732_p10), %s2728_s1, 128, %s2736_s20, %s374_s27  }
  0xd2   : > { %s1767_s8 = sshll.u32 %s2410_s13, 9  ;;  %s3059_s29 = sshll.u32 %s2721_s24, 5 }
  0xd3   : > { %s2769_s28 = scalar_lea.hbm %s3026_s7, %s1767_s8  ;;  %s395_s26 = scalar_lea.vmem [#allocation16], %s3059_s29 }
  0xd4   : > { %s403_s9 = sshll.u32 %s395_s26, 4  ;;  %s392_s0 = scalar_lea.sflag [#allocation17], %s2721_s24  ;;  %s2773_s9 = int_to_ptr.vmem [resolvable:$true] %s403_s9 }
  0xd5   : > { %s2254_s2 = scalar_lea.hbm %s2769_s28, 512  ;;  %s2259_s20 = scalar_lea.hbm %s3026_s7, 1024 }
  0xd6   : > { %p2255_p4 = scmp.ne.s32.totalorder %s2769_s28, %s2254_s2  ;;  %p2260_p0 = scmp.lt.u32.totalorder %s2769_s28, %s3026_s7 }
  0xd7   : > { %p2261_p7 = scmp.lt.u32.totalorder %s2259_s20, %s2254_s2  ;;  %p2263_p8 = scmp.lt.u32.totalorder %s2254_s2, %s2769_s28 }
  0xd8   : > { %p2257_p9 = pnand %p2255_p4, %p2226_p1 }
  0xd9   : > { %p2262_p5 = por %p2261_p7, %p2260_p0 }
  0xda   : > { %p2258_p12 = pneg %p2257_p9 }
  0xdb   : > { %p2264_p3 = por %p2263_p8, %p2262_p5 }
  0xdd   : > { %p2265_p11 = pnand %p2264_p3, %p2258_p12 }
  0xdf   : > { %2268 = shalt.err (!%p2265_p11)
}
  0xe0   : > { %s2269_s18 = scalar_lea.vmem %s2773_s9, 512  ;;  %s2425_s29 = smov [#allocation16]  }
  0xe1   : > { %p2270_p6 = scmp.ne.s32.totalorder %s2773_s9, %s2269_s18  ;;  %s2274_s26 = sshll.u32 %s2425_s29, 4  ;;  %s2275_s26 = int_to_ptr.vmem [resolvable:$false] %s2274_s26 }
  0xe2   : > { %s2276_s27 = scalar_lea.vmem %s2275_s26, 1024  ;;  %p2277_p9 = scmp.lt.s32.totalorder %s2773_s9, %s2275_s26 }
  0xe3   : > { %p2272_p13 = pnand %p2270_p6, %p2226_p1  ;;  %p2278_p0 = scmp.lt.s32.totalorder %s2276_s27, %s2269_s18 }
  0xe5   : > { %p2273_p4 = pneg %p2272_p13  ;;  %p2279_p7 = por %p2278_p0, %p2277_p9 }
  0xe7   : > { %p2280_p5 = pnand %p2279_p7, %p2273_p4 }
  0xe9   : > { %2283 = shalt.err (!%p2280_p5)
}
  0xea   : > { %s3060_s2 = smov 8   ;;  %s3061_s1 = smov 128  }
  0xeb   : > { %1948 = dma.hbm_to_vmem [thread:$0]  (!%p2732_p10), %s2769_s28, 512, %s2773_s9, %s392_s0, %s3061_s1, %s3061_s1, %s3060_s2  }
  0xec   : > { %p3062_p1 = scmp.ne.s32.totalorder %s3046_s17, 0 }
  0xed   : > { %s2807_s20 = sand.u32 (!%p3062_p1), 1, %s2398_s10  }
  0xee   : > { %415 = sbr.rel (%p3062_p1) target bundleno = 1713 (0x6b1), region = 52  ;;  %s1726_s8 = sshll.u32 (!%p3062_p1), %s2807_s20, 3 }
  0xef   : > { %s418_s21 = scalar_lea.sflag (!%p3062_p1), [#allocation5], %s2807_s20  ;;  %s2813_s12 = scalar_lea.vmem (!%p3062_p1), [#allocation4], %s1726_s8 }
  0xf5   : > { %2365 = dma.done.wait (%p2704_p2), %s418_s21, 128  }
  0xf6   : > { %2367 = vsyncadd (%p2704_p2), %s418_s21, 4294967168  ;;  %p3063_p10 = scmp.ne.s32.totalorder %s3045_s16, 0 }
  0xf8   : > { %2369 = dma.done.wait (%p3063_p10), [#allocation8], 528  }
  0xf9   : > { %2371 = vsyncadd (%p3063_p10), [#allocation8], 4294966768 }
  0xfa   : > { %2373 = dma.done.wait (%p3063_p10), [#allocation11], 528  }
  0xfb   : > { %2375 = vsyncadd (%p3063_p10), [#allocation11], 4294966768 }
  0xfc   : > { %2377 = dma.done.wait (%p3063_p10), [#allocation14], 528  }
  0xfd   : > { %2379 = vsyncadd (%p3063_p10), [#allocation14], 4294966768  ;;  %s1733_s0 = sshll.u32 %s2807_s20, 5  ;;  %s451_s17 = scalar_lea.sflag [#allocation17], %s2807_s20 }
  0xfe   : > { %s2835_s24 = scalar_lea.vmem [#allocation16], %s1733_s0 }
  0xff   : > { %2381 = dma.done.wait (%p2704_p2), %s451_s17, 512  }
 0x100   : > { %2383 = vsyncadd (%p2704_p2), %s451_s17, 4294966784  ;;  %v2426_v0 = vmov 0.0|0.0   ;;  %vm2427_vm0 = vmmov 0   ;;  %v2428_v1 = vmov 0.0   ;;  %v504_v2 = vld [vmem:[#allocation10] sm:$0xff]  ;;  %v505_v3 = vld [vmem:[#allocation10 + $0x8] sm:$0xff] }
 0x101   : > { %1873 = vmatprep.subr.bf16.mxu0 %v2426_v0  ;;  %1808 = vmatprep.mubr.msk.f32.mxu0 %vm2427_vm0, %v2428_v1  ;;  %v506_v4 = vld [vmem:[#allocation10 + $0x10] sm:$0xff]  ;;  %v1874_v5 = vpack.c.bf16 %v505_v3, %v504_v2  ;;  %v507_v6 = vld [vmem:[#allocation10 + $0x18] sm:$0xff]  ;;  %v595_v8 = vld [vmem:[#allocation7 + $0x8] sm:$0xff]  ;;  %vm515_vm1 = vcmask 261120   ;;  %vm589_vm2 = vcmask 523264   ;;  %vm681_vm3 = vcmask 64512  }
 0x102   : > { %1879 = vmatprep.subr.bf16.mxu1 %v2426_v0  ;;  %1819 = vmatprep.mubr.msk.f32.mxu1 %vm2427_vm0, %v2428_v1  ;;  %v594_v7 = vld [vmem:[#allocation7] sm:$0xff]  ;;  %v596_v9 = vld [vmem:[#allocation7 + $0x10] sm:$0xff]  ;;  %v597_v10 = vld [vmem:[#allocation7 + $0x18] sm:$0xff]  ;;  %v1877_v11 = vpack.c.bf16 %v507_v6, %v506_v4  ;;  %s2429_s16 = smov 112   ;;  %s2430_s23 = smov 120   ;;  %vm1028_vm4 = vcmask 130112  }
 0x103   : > { %1875 = vmatpush3.bf16.msra.mxu0 %v1874_v5  ;;  %v1880_v12 = vpack.c.bf16 %v595_v8, %v594_v7  ;;  %v1883_v13 = vpack.c.bf16 %v597_v10, %v596_v9  ;;  %v503_v14 = vld [vmem:[%s2813_s12] sm:$0xff]  ;;  %v1736_v15 = vld [vmem:[#allocation12] ss:$0 sm:$0xff]  ;;  %v1738_v21 = vld [vmem:[#allocation9] ss:$0 sm:$0xff]  ;;  %s2431_s28 = smov 104  }
 0x104   : > { %1876 = vmatprep.subr.bf16.mxu0 %v2426_v0  ;;  %v680_v30 = vld [vmem:[%s2835_s24] sm:$0xff]  ;;  %v1743_v35 = vld [vmem:[%s2835_s24 + $0x8] sm:$0xff]  ;;  %v1748_v39 = vld [vmem:[%s2835_s24 + $0x10] sm:$0xff]  ;;  %s2432_s9 = smov 96   ;;  %s2433_s18 = smov 80   ;;  %vm1208_vm5 = vcmask 195712  }
 0x105   : > { %1881 = vmatpush3.bf16.msra.mxu1 %v1880_v12  ;;  %v1753_v44 = vld [vmem:[%s2835_s24 + $0x18] sm:$0xff]  ;;  %s2434_s29 = smov 72   ;;  %s2435_s26 = smov 88   ;;  %vm1388_vm6 = vcmask 261312  }
 0x106   : > { %1882 = vmatprep.subr.bf16.mxu1 %v2426_v0  ;;  %s2903_s27 = scalar_lea.vmem [#allocation19], %s1733_s0  ;;  %s2436_s2 = smov 8  }
 0x107   : > { %1878 = vmatpush3.bf16.msra.mxu0 %v1877_v11  ;;  %s2437_s1 = smov 16   ;;  %s3064_s21 = sld [smem:[#allocation28_spill]] }
 0x108   : > { %1832 = vmatprep.subr.mxu0 %v2428_v1  ;;  %s2438_s12 = smov 24   ;;  %s1510_s17 = sshll.u32 %s2903_s27, 4  ;;  %s2936_s17 = int_to_ptr.vmem [resolvable:$true] %s1510_s17 }
 0x109   : > { %1884 = vmatpush3.bf16.msra.mxu1 %v1883_v13  ;;  %p3066_p12 = scmp.ne.s32.totalorder %s3055_s25, 0 }
 0x10a   : > { %1809 = vmatmul.mubr.msk.f32.vlgmr.msra.gmra.mrb[0].mxu0 %vm515_vm1, %v503_v14  ;;  %1822 = vmatprep.subr.mxu1 %v2428_v1 }
 0x10b   : > { %1834 = vmatprep.mubr.msk.f32.mxu0 %vm2427_vm0, %v2428_v1 }
 0x10c   : > { %1820 = vmatmul.mubr.msk.f32.vlgmr.msra.gmra.mrb[0].mxu1 %vm515_vm1, %v503_v14 }
 0x10d   : > { %1824 = vmatprep.mubr.msk.f32.mxu1 %vm2427_vm0, %v2428_v1  ;;  %s1768_s0 = sshll.u32 %s3064_s21, 9 }
 0x1dd   : > { %v585_v16 = vpop.f32.mrb[0].mxu0 }
 0x1de   : > { %v586_v17 = vadd.f32 %v1736_v15, %v585_v16  ;;  %v1810_v18 = vpop.f32.mrb[1].mxu0 }
 0x1df   : > { %v675_v19 = vpop.f32.mrb[0].mxu1 }
 0x1e0   : > { %590 = vst.msk [vmem:[#allocation2] sm:$0xff] %vm589_vm2, %v586_v17  ;;  %v1821_v20 = vpop.f32.mrb[1].mxu1  ;;  %v676_v23 = vadd.f32 %v1738_v21, %v675_v19 }
 0x1e7   : > { %v2858_v22 = vld [vmem:[#allocation2] sm:$0xff] }
 0x1e8   : > { %1036 = vrot.lane.b32.xlu1 %v2858_v22, %s2429_s16  ;;  %856 = vrot.lane.b32.xlu0 %v2858_v22, %s2430_s23 }
 0x1e9   : > { %1823 = vmatpush3.xpose.msk.msra.mxu1 %vm681_vm3, %v2858_v22 }
 0x1ea   : > { %1827 = vmatprep.subr.mxu1 %v2428_v1 }
 0x1ec   : > { %1825 = vmatmul.mubr.msk.f32.vlgmr.msra.gmra.mrb[2].mxu1 %vm681_vm3, %v676_v23  ;;  %1033 = vrot.lane.b32.xlu1 %v676_v23, %s2429_s16 }
 0x1ed   : > { %853 = vrot.lane.b32.xlu0 %v676_v23, %s2430_s23  ;;  %1829 = vmatprep.mubr.msk.f32.mxu1 %vm2427_vm0, %v2428_v1  ;;  %s3065_s23 = sld [smem:[#allocation33_spill]] }
 0x1f0   : > { %1213 = vrot.lane.b32.xlu1 %v676_v23, %s2431_s28 }
 0x1f1   : > { %1216 = vrot.lane.b32.xlu0 %v2858_v22, %s2431_s28 }
 0x1f3   : > { %s2934_s28 = scalar_lea.hbm %s3065_s23, %s1768_s0 }
 0x25a   : > { %v857_v24 = vpop.permute.xlu0 %856  ;;  %v1037_v25 = vpop.permute.xlu1 %1036 }
 0x25b   : > { %1833 = vmatpush3.xpose.msk.msra.mxu0 %vm681_vm3, %v857_v24 }
 0x25c   : > { %1842 = vmatprep.subr.mxu0 %v2428_v1 }
 0x25e   : > { %v1034_v27 = vpop.permute.xlu1 %1033 }
 0x25f   : > { %v854_v26 = vpop.permute.xlu0 %853 }
 0x260   : > { %1835 = vmatmul.mubr.msk.f32.vlgmr.msra.gmra.mrb[2].mxu0 %vm681_vm3, %v854_v26 }
 0x261   : > { %1843 = vmatpush3.xpose.msk.msra.mxu0 %vm681_vm3, %v1037_v25  ;;  %1844 = vmatprep.mubr.msk.f32.mxu0 %vm2427_vm0, %v2428_v1 }
 0x262   : > { %1852 = vmatprep.subr.mxu0 %v2428_v1  ;;  %v1214_v29 = vpop.permute.xlu1 %1213 }
 0x263   : > { %v1217_v28 = vpop.permute.xlu0 %1216 }
 0x264   : > { %1845 = vmatmul.mubr.msk.f32.vlgmr.msra.gmra.mrb[4].mxu0 %vm681_vm3, %v1034_v27 }
 0x265   : > { %1853 = vmatpush3.xpose.msk.msra.mxu0 %vm681_vm3, %v1217_v28  ;;  %1854 = vmatprep.mubr.msk.f32.mxu0 %vm2427_vm0, %v2428_v1 }
 0x266   : > { %1885 = vmatprep.subr.bf16.mxu0 %v2426_v0 }
 0x268   : > { %1855 = vmatmul.mubr.msk.f32.vlgmr.msra.gmra.mrb[6].mxu0 %vm681_vm3, %v1214_v29 }
 0x269   : > { %1870 = vmatprep.mubr.msk.f32.mxu0 %vm2427_vm0, %v2428_v1 }
 0x2bf   : > { %v754_v31 = vpop.f32.mrb[2].mxu1 }
 0x2c0   : > { %v755_v32 = vadd.f32 %v754_v31, %v680_v30  ;;  %v1826_v33 = vpop.f32.mrb[3].mxu1 }
 0x2c2   : > { %v758_v34 = vsel %vm681_vm3, %v755_v32, -inf }
 0x2c3   : > { %759 = vmax.xlane.f32.xlu0 %v758_v34 }
 0x333   : > { %v928_v36 = vpop.f32.mrb[2].mxu0 }
 0x334   : > { %v929_v37 = vadd.f32 %v1743_v35, %v928_v36  ;;  %v1836_v38 = vpop.f32.mrb[3].mxu0 }
 0x335   : > { %v1391_v38 = vld [vmem:[#allocation13] sm:$0xff] }
 0x336   : > { %v932_v40 = vsel %vm681_vm3, %v929_v37, -inf }
 0x337   : > { %933 = vmax.xlane.f32.xlu1 %v932_v40  ;;  %v1108_v41 = vpop.f32.mrb[4].mxu0 }
 0x338   : > { %v1109_v42 = vadd.f32 %v1748_v39, %v1108_v41  ;;  %v1846_v43 = vpop.f32.mrb[5].mxu0  ;;  %v1392_v39 = vld [vmem:[#allocation13 + $0x8] sm:$0xff]  ;;  %v1393_v41 = vld [vmem:[#allocation13 + $0x10] sm:$0xff] }
 0x339   : > { %v1886_v40 = vpack.c.bf16 %v1392_v39, %v1391_v38 }
 0x33a   : > { %v1112_v45 = vsel %vm681_vm3, %v1109_v42, -inf }
 0x33b   : > { %1113 = vmax.xlane.f32.xlu0 %v1112_v45  ;;  %v1288_v46 = vpop.f32.mrb[6].mxu0  ;;  %1887 = vmatpush3.bf16.msra.mxu0 %v1886_v40 }
 0x33c   : > { %v1289_v47 = vadd.f32 %v1753_v44, %v1288_v46  ;;  %v1856_v48 = vpop.f32.mrb[7].mxu0  ;;  %1888 = vmatprep.subr.bf16.mxu0 %v2426_v0 }
 0x33e   : > { %v1292_v49 = vsel %vm681_vm3, %v1289_v47, -inf }
 0x33f   : > { %1293 = vmax.xlane.f32.xlu0 %v1292_v49 }
 0x348   : > { %773 = vrot.lane.b32.xlu1 %v2858_v22, %s2432_s9  ;;  %s1482_s9 = scalar_lea.sflag [#allocation20], %s2807_s20 }
 0x350   : > { %v760_v50 = vpop.xlane.xlu0 %759 }
 0x351   : > { %v761_v51 = vsub.f32 %v755_v32, %v760_v50 }
 0x353   : > { %v762_v52 = vmul.f32 1.442695, %v761_v51 }
 0x355   : > { %2040 = vpow2.f32 %v762_v52 }
 0x35f   : > { %v2041_v53 = vpop.eup %2040 }
 0x360   : > { %v764_v54 = vsel %vm681_vm3, %v2041_v53, 0.0 }
 0x36c   : > { %765 = vadd.xlane.f32.xlu1 %v764_v54 }
 0x3c4   : > { %v934_v55 = vpop.xlane.xlu1 %933 }
 0x3c5   : > { %v935_v56 = vsub.f32 %v929_v37, %v934_v55 }
 0x3c7   : > { %v936_v57 = vmul.f32 1.442695, %v935_v56 }
 0x3c8   : > { %v774_v58 = vpop.permute.xlu1 %773  ;;  %v1114_v59 = vpop.xlane.xlu0 %1113 }
 0x3c9   : > { %2042 = vpow2.f32 %v936_v57  ;;  %v1115_v60 = vsub.f32 %v1109_v42, %v1114_v59  ;;  %1828 = vmatpush3.msra.mxu1 %v774_v58  ;;  %v1394_v42 = vld [vmem:[#allocation13 + $0x18] sm:$0xff] }
 0x3ca   : > { %1837 = vmatprep.subr.mxu1 %v2428_v1  ;;  %v1889_v43 = vpack.c.bf16 %v1394_v42, %v1393_v41 }
 0x3cb   : > { %v1116_v61 = vmul.f32 1.442695, %v1115_v60 }
 0x3cc   : > { %v1294_v62 = vpop.xlane.xlu0 %1293  ;;  %1890 = vmatpush3.bf16.msra.mxu0 %v1889_v43 }
 0x3cd   : > { %2044 = vpow2.f32 %v1116_v61  ;;  %v1295_v63 = vsub.f32 %v1289_v47, %v1294_v62 }
 0x3cf   : > { %v1296_v2 = vmul.f32 1.442695, %v1295_v63 }
 0x3d1   : > { %2046 = vpow2.f32 %v1296_v2 }
 0x3d3   : > { %v2043_v3 = vpop.eup %2042 }
 0x3d4   : > { %v938_v4 = vsel %vm681_vm3, %v2043_v3, 0.0 }
 0x3d5   : > { %939 = vadd.xlane.f32.xlu0 %v938_v4 }
 0x3d7   : > { %v2045_v5 = vpop.eup %2044 }
 0x3d8   : > { %v1118_v6 = vsel %vm681_vm3, %v2045_v5, 0.0 }
 0x3d9   : > { %1119 = vadd.xlane.f32.xlu1 %v1118_v6 }
 0x3db   : > { %v2047_v7 = vpop.eup %2046 }
 0x3dc   : > { %v1298_v8 = vsel %vm681_vm3, %v2047_v7, 0.0 }
 0x3dd   : > { %1299 = vadd.xlane.f32.xlu0 %v1298_v8 }
 0x3ea   : > { %1128 = vrot.lane.b32.xlu1 %v2858_v22, %s2433_s18  ;;  %s2284_s18 = scalar_lea.vmem %s2936_s17, 512 }
 0x3eb   : > { %p2285_p2 = scmp.ne.s32.totalorder %s2936_s17, %s2284_s18 }
 0x3ed   : > { %p2286_p8 = pnand %p2285_p2, %p3066_p12 }
 0x3ee   : > { %1308 = vrot.lane.b32.xlu1 %v2858_v22, %s2434_s29  ;;  %s2439_s29 = smov [#allocation19]  }
 0x3ef   : > { %p2287_p3 = pneg %p2286_p8 }
 0x3f3   : > { %948 = vrot.lane.b32.xlu0 %v2858_v22, %s2435_s26  ;;  %s2288_s26 = sshll.u32 %s2439_s29, 4  ;;  %s2289_s26 = int_to_ptr.vmem [resolvable:$false] %s2288_s26 }
 0x3f4   : > { %p2291_p11 = scmp.lt.s32.totalorder %s2936_s17, %s2289_s26 }
 0x3f9   : > { %v766_v9 = vpop.xlane.xlu1 %765 }
 0x3fa   : > { %2048 = vrcp.f32 %v766_v9 }
 0x404   : > { %v2049_v10 = vpop.eup %2048 }
 0x405   : > { %v768_v11 = vmul.f32 %v2049_v10, %v766_v9 }
 0x407   : > { %v769_v12 = vsub.f32 2.0, %v768_v11 }
 0x409   : > { %v770_v13 = vmul.f32 %v2049_v10, %v769_v12 }
 0x40b   : > { %v771_v14 = vmul.f32 %v2041_v53, %v770_v13 }
 0x40d   : > { %772 = vst.msk [vmem:[%s2903_s27] sm:$0xff] %vm681_vm3, %v771_v14  ;;  %1830 = vmatmul.mubr.msk.f32.vlgmr.msra.gmra.mrb[4].mxu1 %vm681_vm3, %v771_v14 }
 0x40e   : > { %1839 = vmatprep.mubr.msk.f32.mxu1 %vm2427_vm0, %v2428_v1 }
 0x462   : > { %v940_v15 = vpop.xlane.xlu0 %939 }
 0x463   : > { %2050 = vrcp.f32 %v940_v15 }
 0x466   : > { %v1120_v16 = vpop.xlane.xlu1 %1119 }
 0x467   : > { %2052 = vrcp.f32 %v1120_v16 }
 0x46a   : > { %v1300_v17 = vpop.xlane.xlu0 %1299  ;;  %v1129_v27 = vpop.permute.xlu1 %1128 }
 0x46b   : > { %2054 = vrcp.f32 %v1300_v17 }
 0x46d   : > { %v2051_v18 = vpop.eup %2050 }
 0x46e   : > { %v942_v19 = vmul.f32 %v2051_v18, %v940_v15  ;;  %v949_v20 = vpop.permute.xlu0 %948  ;;  %v1309_v34 = vpop.permute.xlu1 %1308 }
 0x46f   : > { %1838 = vmatpush3.msra.mxu1 %v949_v20 }
 0x470   : > { %v943_v21 = vsub.f32 2.0, %v942_v19  ;;  %1847 = vmatprep.subr.mxu1 %v2428_v1 }
 0x471   : > { %v2053_v22 = vpop.eup %2052 }
 0x472   : > { %v944_v23 = vmul.f32 %v2051_v18, %v943_v21  ;;  %v1122_v24 = vmul.f32 %v2053_v22, %v1120_v16 }
 0x474   : > { %v945_v25 = vmul.f32 %v2043_v3, %v944_v23  ;;  %v1123_v26 = vsub.f32 2.0, %v1122_v24 }
 0x475   : > { %v2055_v28 = vpop.eup %2054 }
 0x476   : > { %1746 = vst.msk [vmem:[%s2903_s27 + $0x8] sm:$0xff] %vm681_vm3, %v945_v25  ;;  %v1124_v29 = vmul.f32 %v2053_v22, %v1123_v26  ;;  %v1302_v30 = vmul.f32 %v2055_v28, %v1300_v17  ;;  %1840 = vmatmul.mubr.msk.f32.vlgmr.msra.gmra.mrb[6].mxu1 %vm681_vm3, %v945_v25 }
 0x477   : > { %1848 = vmatpush3.msra.mxu1 %v1129_v27  ;;  %1849 = vmatprep.mubr.msk.f32.mxu1 %vm2427_vm0, %v2428_v1 }
 0x478   : > { %v1125_v31 = vmul.f32 %v2045_v5, %v1124_v29  ;;  %v1303_v32 = vsub.f32 2.0, %v1302_v30  ;;  %1857 = vmatprep.subr.mxu1 %v2428_v1 }
 0x47a   : > { %1751 = vst.msk [vmem:[%s2903_s27 + $0x10] sm:$0xff] %vm681_vm3, %v1125_v31  ;;  %v1304_v33 = vmul.f32 %v2055_v28, %v1303_v32  ;;  %1850 = vmatmul.mubr.msk.f32.vlgmr.msra.gmra.mrb[8].mxu1 %vm681_vm3, %v1125_v31 }
 0x47b   : > { %1858 = vmatpush3.msra.mxu1 %v1309_v34  ;;  %1859 = vmatprep.mubr.msk.f32.mxu1 %vm2427_vm0, %v2428_v1 }
 0x47c   : > { %v1305_v35 = vmul.f32 %v2047_v7, %v1304_v33 }
 0x47e   : > { %1756 = vst.msk [vmem:[%s2903_s27 + $0x18] sm:$0xff] %vm681_vm3, %v1305_v35  ;;  %1860 = vmatmul.mubr.msk.f32.vlgmr.msra.gmra.mrb[10].mxu1 %vm681_vm3, %v1305_v35  ;;  %s2290_s27 = scalar_lea.vmem %s2289_s26, 1024 }
 0x47f   : > { %p2292_p6 = scmp.lt.s32.totalorder %s2290_s27, %s2284_s18 }
 0x481   : > { %p2293_p13 = por %p2292_p6, %p2291_p11 }
 0x483   : > { %p2294_p4 = pnand %p2293_p13, %p2287_p3 }
 0x4e0   : > { %v845_v36 = vpop.f32.mrb[4].mxu1 }
 0x4e1   : > { %849 = vst.msk [vmem:[#allocation3] sm:$0xff] %vm681_vm3, %v845_v36  ;;  %v1831_v37 = vpop.f32.mrb[5].mxu1 }
 0x549   : > { %v1020_v44 = vpop.f32.mrb[6].mxu1 }
 0x54a   : > { %1025 = vrot.lane.b32.xlu0 %v1020_v44, %s2436_s2  ;;  %v1841_v1 = vpop.f32.mrb[7].mxu1 }
 0x54d   : > { %v1200_v45 = vpop.f32.mrb[8].mxu1 }
 0x54e   : > { %1205 = vrot.lane.b32.xlu1 %v1200_v45, %s2437_s1  ;;  %v1851_v46 = vpop.f32.mrb[9].mxu1 }
 0x551   : > { %v1380_v47 = vpop.f32.mrb[10].mxu1 }
 0x552   : > { %1385 = vrot.lane.b32.xlu0 %v1380_v47, %s2438_s12  ;;  %v1861_v48 = vpop.f32.mrb[11].mxu1 }
 0x5bc   : > { %v1026_v49 = vpop.permute.xlu0 %1025 }
 0x5bd   : > { %1029 = vst.msk [vmem:[#allocation3] sm:$0xff] %vm1028_vm4, %v1026_v49 }
 0x5c0   : > { %v1206_v0 = vpop.permute.xlu1 %1205 }
 0x5c1   : > { %1209 = vst.msk [vmem:[#allocation3] sm:$0xff] %vm1208_vm5, %v1206_v0 }
 0x5c4   : > { %v1386_v50 = vpop.permute.xlu0 %1385 }
 0x5c5   : > { %1389 = vst.msk [vmem:[#allocation3] sm:$0xff] %vm1388_vm6, %v1386_v50 }
 0x5cc   : > { %v1390_v51 = vld [vmem:[#allocation3] sm:$0xff] }
 0x5cd   : > { %1871 = vmatmul.mubr.msk.f32.vlgmr.msra.gmra.mrb[8].mxu0 %vm515_vm1, %v1390_v51 }
 0x5ce   : > { %2297 = shalt.err (!%p2294_p4)
}
 0x5cf   : > { %s2298_s1 = scalar_lea.hbm %s2934_s28, 512  ;;  %s2302_s24 = scalar_lea.hbm %s3065_s23, 1024 }
 0x5d0   : > { %p2299_p9 = scmp.ne.s32.totalorder %s2934_s28, %s2298_s1  ;;  %p2303_p5 = scmp.lt.u32.totalorder %s2934_s28, %s3065_s23 }
 0x5d1   : > { %p2304_p1 = scmp.lt.u32.totalorder %s2302_s24, %s2298_s1  ;;  %p2306_p2 = scmp.lt.u32.totalorder %s2298_s1, %s2934_s28 }
 0x5d2   : > { %p2300_p0 = pnand %p2299_p9, %p3066_p12 }
 0x5d3   : > { %p2305_p10 = por %p2304_p1, %p2303_p5 }
 0x5d4   : > { %p2301_p7 = pneg %p2300_p0 }
 0x5d5   : > { %p2307_p8 = por %p2306_p2, %p2305_p10 }
 0x5d7   : > { %p2308_p3 = pnand %p2307_p8, %p2301_p7 }
 0x5d9   : > { %2311 = shalt.err (!%p2308_p3)
}
 0x5da   : > { %s2440_s18 = smov 128   ;;  %v1758_v52 = vld [vmem:[#allocation15] ss:$0 sm:$0xff]  ;;  %s1762_s26 = sshll.u32 %s3064_s21, 7 }
 0x5db   : > { %1920 = dma.vmem_to_hbm [thread:$0]  (%p3066_p12), %s2936_s17, 512, %s2934_s28, %s1482_s9, %s2440_s18, %s2440_s18, %s2436_s2  }
 0x5dc   : > { %s491_s27 = scalar_lea.vmem [#allocation18], %s1726_s8  ;;  %s3067_s24 = sld [smem:[#allocation32_spill]] }
 0x5dd   : > { %s1496_s1 = sshll.u32 %s491_s27, 4  ;;  %s1477_s2 = scalar_lea.sflag [#allocation6], %s2807_s20  ;;  %s2971_s1 = int_to_ptr.vmem [resolvable:$true] %s1496_s1 }
 0x5de   : > { %s2312_s21 = scalar_lea.vmem %s2971_s1, 128  ;;  %s2441_s8 = smov [#allocation18]  }
 0x5df   : > { %p2313_p11 = scmp.ne.s32.totalorder %s2971_s1, %s2312_s21  ;;  %s2316_s17 = sshll.u32 %s2441_s8, 4  ;;  %s2317_s17 = int_to_ptr.vmem [resolvable:$false] %s2316_s17 }
 0x5e0   : > { %s2318_s28 = scalar_lea.vmem %s2317_s17, 256  ;;  %p2319_p4 = scmp.lt.s32.totalorder %s2971_s1, %s2317_s17 }
 0x5e1   : > { %p2314_p6 = pnand %p2313_p11, %p3066_p12  ;;  %p2320_p9 = scmp.lt.s32.totalorder %s2318_s28, %s2312_s21 }
 0x5e2   : > { %s2969_s16 = scalar_lea.hbm %s3067_s24, %s1762_s26 }
 0x5e3   : > { %p2315_p13 = pneg %p2314_p6  ;;  %p2321_p0 = por %p2320_p9, %p2319_p4 }
 0x5e5   : > { %p2322_p7 = pnand %p2321_p0, %p2315_p13 }
 0x6a0   : > { %v1471_v53 = vpop.f32.mrb[8].mxu0 }
 0x6a1   : > { %v1472_v54 = vadd.f32 %v1758_v52, %v1471_v53  ;;  %v1872_v55 = vpop.f32.mrb[9].mxu0 }
 0x6a3   : > { %1475 = vst.msk [vmem:[%s491_s27] sm:$0xff] %vm515_vm1, %v1472_v54 }
 0x6a4   : > { %2325 = shalt.err (!%p2322_p7)
}
 0x6a5   : > { %s2326_s20 = scalar_lea.hbm %s2969_s16, 128  ;;  %s2330_s18 = scalar_lea.hbm %s3067_s24, 256 }
 0x6a6   : > { %p2327_p5 = scmp.ne.s32.totalorder %s2969_s16, %s2326_s20  ;;  %p2331_p2 = scmp.lt.u32.totalorder %s2969_s16, %s3067_s24 }
 0x6a7   : > { %p2332_p8 = scmp.lt.u32.totalorder %s2330_s18, %s2326_s20  ;;  %p2334_p11 = scmp.lt.u32.totalorder %s2326_s20, %s2969_s16 }
 0x6a8   : > { %p2328_p1 = pnand %p2327_p5, %p3066_p12 }
 0x6a9   : > { %p2333_p3 = por %p2332_p8, %p2331_p2 }
 0x6aa   : > { %p2329_p10 = pneg %p2328_p1 }
 0x6ab   : > { %p2335_p6 = por %p2334_p11, %p2333_p3 }
 0x6ad   : > { %p2336_p13 = pnand %p2335_p6, %p2329_p10 }
 0x6af   : > { %2339 = shalt.err (!%p2336_p13)
}
 0x6b0   : > { %1919 = dma.vmem_to_hbm [thread:$0]  (%p3066_p12), %s2971_s1, 128, %s2969_s16, %s1477_s2  }
 0x6b1 PF: > { %s1525_s12 = sand.u32 1, %s2394_s30   ;;  %p3068_p4 = scmp.ne.s32.totalorder %s3056_s22, 0 }
 0x6b2   : > { %p3069_p9 = scmp.ge.s32.totalorder %s2414_s14, 2  ;;  %s1526_s0 = scalar_lea.sflag [#allocation6], %s1525_s12 }
 0x6b4   : > { %p1950_p0 = pnand %p3069_p9, %p3068_p4 }
 0x6b6   : > { %2385 = dma.done.wait (!%p1950_p0), %s1526_s0, 128  }
 0x6b7   : > { %2387 = vsyncadd (!%p1950_p0), %s1526_s0, 4294967168  ;;  %s1535_s21 = scalar_lea.sflag [#allocation20], %s1525_s12 }
 0x6b8   : > { %2389 = dma.done.wait (!%p1950_p0), %s1535_s21, 512  }
 0x6b9   : > { %2391 = vsyncadd (!%p1950_p0), %s1535_s21, 4294966784  ;;  %s35_s14 = sadd.s32 1, %s2414_s14   ;;  %s3070_s30 = smov %s2398_s10 }
 0x6ba   : > { %p32_p7 = scmp.ge.s32.totalorder %s35_s14, 4   ;;  %s3071_s10 = smov %s2402_s11 }
 0x6bb   : > { %s3072_s11 = smov %s2713_s19  ;;  %s3073_s12 = smov %s2410_s13 }
 0x6bc   : > { %s3074_s13 = smov %s3076_s15  ;;  %34 = sbr.rel (!%p32_p7) target bundleno = 19 (0x13), region = 162 }
 0x6c3   :  { %1540 = vsyncpa [#allocation5], 1 }
 0x6c4   :  { %1542 = vsyncpa [#allocation5 + $0x1], 1 }
 0x6c5   :  { %1543 = vsyncpa [#allocation8], 1 }
 0x6c6   :  { %1544 = vsyncpa [#allocation11], 1 }
 0x6c7   :  { %1545 = vsyncpa [#allocation14], 1 }
 0x6c8   :  { %1546 = vsyncpa [#allocation17], 1 }
 0x6c9   :  { %1548 = vsyncpa [#allocation17 + $0x1], 1 }
 0x6ca   :  { %1549 = vsyncpa [#allocation6], 1 }
 0x6cb   :  { %1551 = vsyncpa [#allocation6 + $0x1], 1 }
 0x6cc   :  { %1552 = vsyncpa [#allocation20], 1 }
 0x6cd   :  { %1554 = vsyncpa [#allocation20 + $0x1], 1 }

</bundles_post_ra>
